<compile_context>
chip_gen: v7x
topology: tpu7x:2x2x1
jax: 0.10.0
libtpu: 0.0.40
codegen_flags: <defaults>
</compile_context>

<pallas_src>
import functools

import jax
import jax.numpy as jnp
from jax import lax
from jax.experimental import pallas as pl
from jax.experimental.pallas import tpu as pltpu

EPS = 1e-5
VMEM_LIMIT = 48 * 1024 * 1024   # explicit scoped-VMEM budget (fits v5e/v6e/v7x)


def _relu(x):
    return jnp.maximum(x, 0.0)


def _row_mask(tile_n, n_valid):
    """(tile_n, 1) bool mask of real (non-padding) rows for the current N tile."""
    n = pl.program_id(1)
    rows = lax.broadcasted_iota(jnp.int32, (tile_n, 1), 0) + n * tile_n
    return rows < n_valid


# --------------------------------------------------------------------------
# Kernel 1: 3-layer point MLP (conv+BN+ReLU x3) fused with global max over N.
#   Used for the STN3d point path.  Grid (B, Npad//TN); N axis is a reduction
#   ("arbitrary") with the output resident in VMEM as a max-accumulator.
# --------------------------------------------------------------------------
def _mlp3_max_kernel(x_ref, w1_ref, s1_ref, b1_ref, w2_ref, s2_ref, b2_ref,
                     w3_ref, s3_ref, b3_ref, o_ref, *, tile_n, n_valid):
    n = pl.program_id(1)

    @pl.when(n == 0)
    def _():
        o_ref[...] = jnp.full_like(o_ref, -jnp.inf)

    x = x_ref[0]                                                     # (TN, Cin) bf16
    h = _relu(jnp.dot(x, w1_ref[...], preferred_element_type=jnp.float32)
              * s1_ref[...] + b1_ref[...])                           # (TN, 64) f32
    h = _relu(jnp.dot(h.astype(jnp.bfloat16), w2_ref[...],
                      preferred_element_type=jnp.float32)
              * s2_ref[...] + b2_ref[...])                           # (TN, 128) f32
    h = _relu(jnp.dot(h.astype(jnp.bfloat16), w3_ref[...],
                      preferred_element_type=jnp.float32)
              * s3_ref[...] + b3_ref[...])                           # (TN, 1024) f32
    if n_valid % tile_n != 0:
        h = jnp.where(_row_mask(tile_n, n_valid), h, -jnp.inf)
    o_ref[0] = jnp.maximum(o_ref[0], jnp.max(h, axis=0, keepdims=True))


def mlp3_max(x, n_valid, p1, p2, p3, *, tile_n):
    B, Np, Cin = x.shape
    w1, s1, b1 = p1
    w2, s2, b2 = p2
    w3, s3, b3 = p3
    C1, C2, C3 = w1.shape[1], w2.shape[1], w3.shape[1]
    kernel = functools.partial(_mlp3_max_kernel, tile_n=tile_n, n_valid=n_valid)
    out = pl.pallas_call(
        kernel,
        out_shape=jax.ShapeDtypeStruct((B, 1, C3), jnp.float32),
        grid=(B, Np // tile_n),
        in_specs=[
            pl.BlockSpec((1, tile_n, Cin), lambda b, n: (b, n, 0)),
            pl.BlockSpec((Cin, C1), lambda b, n: (0, 0)),
            pl.BlockSpec((1, C1), lambda b, n: (0, 0)),
            pl.BlockSpec((1, C1), lambda b, n: (0, 0)),
            pl.BlockSpec((C1, C2), lambda b, n: (0, 0)),
            pl.BlockSpec((1, C2), lambda b, n: (0, 0)),
            pl.BlockSpec((1, C2), lambda b, n: (0, 0)),
            pl.BlockSpec((C2, C3), lambda b, n: (0, 0)),
            pl.BlockSpec((1, C3), lambda b, n: (0, 0)),
            pl.BlockSpec((1, C3), lambda b, n: (0, 0)),
        ],
        out_specs=pl.BlockSpec((1, 1, C3), lambda b, n: (b, 0, 0)),
        compiler_params=pltpu.CompilerParams(
            dimension_semantics=("parallel", "arbitrary"),
            vmem_limit_bytes=VMEM_LIMIT),
    )(x, w1, s1, b1, w2, s2, b2, w3, s3, b3)
    return out.reshape(B, C3)


# --------------------------------------------------------------------------
# Kernel 2: fused [input-transform bmm + conv1+BN+ReLU] + [STNkd point MLP +
#   global max].  Produces h1 (bf16, written once) and the fSTN pooled feature
#   in a single pass over the points.  Grid (B, Npad//TN).
# --------------------------------------------------------------------------
def _tconv_fstn_max_kernel(x_ref, t_ref, cw_ref, cs_ref, cb_ref,
                           f1w_ref, f1s_ref, f1b_ref,
                           f2w_ref, f2s_ref, f2b_ref,
                           f3w_ref, f3s_ref, f3b_ref,
                           h1_ref, o_ref, *, tile_n, n_valid):
    n = pl.program_id(1)

    @pl.when(n == 0)
    def _():
        o_ref[...] = jnp.full_like(o_ref, -jnp.inf)

    # Fold the 3x3 input transform into the conv1 weight (tiny f32 matmul).
    w_eff = jnp.dot(t_ref[0], cw_ref[...].astype(jnp.float32),
                    preferred_element_type=jnp.float32)               # (3, 64)
    h1 = _relu(jnp.dot(x_ref[0], w_eff.astype(jnp.bfloat16),
                       preferred_element_type=jnp.float32)
               * cs_ref[...] + cb_ref[...])                           # (TN, 64) f32
    h1_bf = h1.astype(jnp.bfloat16)
    h1_ref[0] = h1_bf

    g = _relu(jnp.dot(h1_bf, f1w_ref[...], preferred_element_type=jnp.float32)
              * f1s_ref[...] + f1b_ref[...])                          # (TN, 64)
    g = _relu(jnp.dot(g.astype(jnp.bfloat16), f2w_ref[...],
                      preferred_element_type=jnp.float32)
              * f2s_ref[...] + f2b_ref[...])                          # (TN, 128)
    g = _relu(jnp.dot(g.astype(jnp.bfloat16), f3w_ref[...],
                      preferred_element_type=jnp.float32)
              * f3s_ref[...] + f3b_ref[...])                          # (TN, 1024)
    if n_valid % tile_n != 0:
        g = jnp.where(_row_mask(tile_n, n_valid), g, -jnp.inf)
    o_ref[0] = jnp.maximum(o_ref[0], jnp.max(g, axis=0, keepdims=True))


def tconv_fstn_max(x, trans, n_valid, conv1, f1, f2, f3, *, tile_n):
    B, Np, Cin = x.shape
    cw, cs, cb = conv1
    f1w, f1s, f1b = f1
    f2w, f2s, f2b = f2
    f3w, f3s, f3b = f3
    C1 = cw.shape[1]        # 64
    F3 = f3w.shape[1]       # 1024
    kernel = functools.partial(_tconv_fstn_max_kernel,
                               tile_n=tile_n, n_valid=n_valid)
    h1, omax = pl.pallas_call(
        kernel,
        out_shape=(jax.ShapeDtypeStruct((B, Np, C1), jnp.bfloat16),
                   jax.ShapeDtypeStruct((B, 1, F3), jnp.float32)),
        grid=(B, Np // tile_n),
        in_specs=[
            pl.BlockSpec((1, tile_n, Cin), lambda b, n: (b, n, 0)),
            pl.BlockSpec((1, Cin, Cin), lambda b, n: (b, 0, 0)),
            pl.BlockSpec((Cin, C1), lambda b, n: (0, 0)),
            pl.BlockSpec((1, C1), lambda b, n: (0, 0)),
            pl.BlockSpec((1, C1), lambda b, n: (0, 0)),
            pl.BlockSpec(f1w.shape, lambda b, n: (0, 0)),
            pl.BlockSpec(f1s.shape, lambda b, n: (0, 0)),
            pl.BlockSpec(f1b.shape, lambda b, n: (0, 0)),
            pl.BlockSpec(f2w.shape, lambda b, n: (0, 0)),
            pl.BlockSpec(f2s.shape, lambda b, n: (0, 0)),
            pl.BlockSpec(f2b.shape, lambda b, n: (0, 0)),
            pl.BlockSpec(f3w.shape, lambda b, n: (0, 0)),
            pl.BlockSpec(f3s.shape, lambda b, n: (0, 0)),
            pl.BlockSpec(f3b.shape, lambda b, n: (0, 0)),
        ],
        out_specs=(
            pl.BlockSpec((1, tile_n, C1), lambda b, n: (b, n, 0)),
            pl.BlockSpec((1, 1, F3), lambda b, n: (b, 0, 0)),
        ),
        compiler_params=pltpu.CompilerParams(
            dimension_semantics=("parallel", "arbitrary"),
            vmem_limit_bytes=VMEM_LIMIT),
    )(x, trans, cw, cs, cb, f1w, f1s, f1b, f2w, f2s, f2b, f3w, f3s, f3b)
    return h1, omax.reshape(B, F3)


# --------------------------------------------------------------------------
# Kernel 3: feature transform folded into conv2 (W2_eff = trans_feat @ W2,
#   computed once per batch into a VMEM scratch) + conv2+BN+ReLU +
#   conv3+BN (no ReLU) fused with the global max pool over N.
# --------------------------------------------------------------------------
def _ftrans_mlp2_max_kernel(h1_ref, t_ref, w2_ref, s2_ref, b2_ref,
                            w3_ref, s3_ref, b3_ref, o_ref, w2eff_ref,
                            *, tile_n, n_valid):
    n = pl.program_id(1)

    @pl.when(n == 0)
    def _():
        o_ref[...] = jnp.full_like(o_ref, -jnp.inf)
        # Fold the 64x64 feature transform into the conv2 weight, once per b.
        w2eff_ref[...] = jnp.dot(
            t_ref[0].astype(jnp.bfloat16), w2_ref[...],
            preferred_element_type=jnp.float32).astype(jnp.bfloat16)

    h = _relu(jnp.dot(h1_ref[0], w2eff_ref[...],
                      preferred_element_type=jnp.float32)
              * s2_ref[...] + b2_ref[...])                            # (TN, 128)
    h = jnp.dot(h.astype(jnp.bfloat16), w3_ref[...],
                preferred_element_type=jnp.float32) \
        * s3_ref[...] + b3_ref[...]                                   # (TN, 1024)
    if n_valid % tile_n != 0:
        h = jnp.where(_row_mask(tile_n, n_valid), h, -jnp.inf)
    o_ref[0] = jnp.maximum(o_ref[0], jnp.max(h, axis=0, keepdims=True))


def ftrans_mlp2_max(h1, trans_feat, n_valid, p2, p3, *, tile_n):
    B, Np, C = h1.shape
    w2, s2, b2 = p2
    w3, s3, b3 = p3
    C2, C3 = w2.shape[1], w3.shape[1]
    kernel = functools.partial(_ftrans_mlp2_max_kernel,
                               tile_n=tile_n, n_valid=n_valid)
    out = pl.pallas_call(
        kernel,
        out_shape=jax.ShapeDtypeStruct((B, 1, C3), jnp.float32),
        grid=(B, Np // tile_n),
        in_specs=[
            pl.BlockSpec((1, tile_n, C), lambda b, n: (b, n, 0)),
            pl.BlockSpec((1, C, C), lambda b, n: (b, 0, 0)),
            pl.BlockSpec((C, C2), lambda b, n: (0, 0)),
            pl.BlockSpec((1, C2), lambda b, n: (0, 0)),
            pl.BlockSpec((1, C2), lambda b, n: (0, 0)),
            pl.BlockSpec((C2, C3), lambda b, n: (0, 0)),
            pl.BlockSpec((1, C3), lambda b, n: (0, 0)),
            pl.BlockSpec((1, C3), lambda b, n: (0, 0)),
        ],
        out_specs=pl.BlockSpec((1, 1, C3), lambda b, n: (b, 0, 0)),
        scratch_shapes=[pltpu.VMEM((C, C2), jnp.bfloat16)],
        compiler_params=pltpu.CompilerParams(
            dimension_semantics=("parallel", "arbitrary"),
            vmem_limit_bytes=VMEM_LIMIT),
    )(h1, trans_feat, w2, s2, b2, w3, s3, b3)
    return out.reshape(B, C3)


# --------------------------------------------------------------------------
# Kernel 4: FC head (shared by STN3d / STNkd regressors and the classifier):
#   fc1+BN+ReLU -> [dropout=id] -> fc2+BN+ReLU -> fc3 (+bias; identity folded
#   into the bias for the STN heads).  Weights bf16, epilogue f32.
# --------------------------------------------------------------------------
def _fc_head_kernel(f_ref, w1_ref, s1_ref, b1_ref, w2_ref, s2_ref, b2_ref,
                    w3_ref, b3_ref, o_ref):
    f = f_ref[...].astype(jnp.bfloat16)
    h = _relu(jnp.dot(f, w1_ref[...], preferred_element_type=jnp.float32)
              * s1_ref[...] + b1_ref[...])
    h = _relu(jnp.dot(h.astype(jnp.bfloat16), w2_ref[...],
                      preferred_element_type=jnp.float32)
              * s2_ref[...] + b2_ref[...])
    o_ref[...] = (jnp.dot(h.astype(jnp.bfloat16), w3_ref[...],
                          preferred_element_type=jnp.float32)
                  + b3_ref[...])


def fc_head(f, p1, p2, w3, b3):
    B, _ = f.shape
    w1, s1, b1 = p1
    w2, s2, b2 = p2
    C3 = w3.shape[1]
    args = (f, w1, s1, b1, w2, s2, b2, w3, b3)

    def full_spec(a):
        nd = a.ndim
        return pl.BlockSpec(a.shape, lambda i, nd=nd: (0,) * nd)

    return pl.pallas_call(
        _fc_head_kernel,
        out_shape=jax.ShapeDtypeStruct((B, C3), jnp.float32),
        grid=(1,),
        in_specs=[full_spec(a) for a in args],
        out_specs=pl.BlockSpec((B, C3), lambda i: (0, 0)),
        compiler_params=pltpu.CompilerParams(vmem_limit_bytes=VMEM_LIMIT),
    )(*args)


# --------------------------------------------------------------------------
# Deterministic parameter init (matches module __init__ shapes; BN folded;
# matmul weights stored in bf16, scale/shift/bias kept f32).
# --------------------------------------------------------------------------
def init_params(key, num_class=40, channel=3, ins_num=2400):
    keys = iter(jax.random.split(key, 128))

    def lin_w(cin, cout):
        s = 1.0 / (cin ** 0.5)
        return jax.random.uniform(next(keys), (cin, cout), jnp.float32, -s, s)

    def lin_b(cin, cout):
        s = 1.0 / (cin ** 0.5)
        return jax.random.uniform(next(keys), (1, cout), jnp.float32, -s, s)

    def conv_bn(cin, cout):
        # conv/linear (with bias) followed by BatchNorm, folded to (W, scale, shift)
        w = lin_w(cin, cout)
        bias = lin_b(cin, cout)
        gamma = 1.0 + 0.1 * jax.random.normal(next(keys), (1, cout), jnp.float32)
        beta = 0.1 * jax.random.normal(next(keys), (1, cout), jnp.float32)
        mean = 0.1 * jax.random.normal(next(keys), (1, cout), jnp.float32)
        var = jax.random.uniform(next(keys), (1, cout), jnp.float32, 0.5, 1.5)
        scale = gamma / jnp.sqrt(var + EPS)
        shift = beta - mean * scale + scale * bias
        return (w.astype(jnp.bfloat16), scale, shift)

    def stn_params(cin, k):
        return {
            "conv1": conv_bn(cin, 64),
            "conv2": conv_bn(64, 128),
            "conv3": conv_bn(128, 1024),
            "fc1": conv_bn(1024, 512),
            "fc2": conv_bn(512, 256),
            "fc3_w": lin_w(256, k * k).astype(jnp.bfloat16),
            # identity matrix folded into the fc3 bias (f32)
            "fc3_b": lin_b(256, k * k)
                     + jnp.eye(k, dtype=jnp.float32).reshape(1, k * k),
        }

    p = {}
    p["stn"] = stn_params(channel, 3)       # STN3d
    p["fstn"] = stn_params(64, 64)          # STNkd(k=64)
    p["conv1"] = conv_bn(channel, 64)       # encoder conv1 + bn1
    p["conv2"] = conv_bn(64, 128)           # encoder conv2 + bn2
    p["conv3"] = conv_bn(128, 1024)         # encoder conv3 + bn3
    p["fc1"] = conv_bn(1024, 512)           # classifier fc1 + bn1
    p["fc2"] = conv_bn(512, 256)            # classifier fc2 + bn2 (dropout = id)
    p["fc3_w"] = lin_w(256, num_class).astype(jnp.bfloat16)
    p["fc3_b"] = lin_b(256, num_class)
    # arch parameter alphas (unused in forward)
    p["alphas_normal"] = jnp.ones((ins_num,), jnp.float32)
    return p


# --------------------------------------------------------------------------
# Full forward (mirrors PNet_Cls_Net_param.forward, inference mode)
# --------------------------------------------------------------------------
def forward(params, x, *, tile_n=512):
    # x: (B, 3, N) -- PyTorch input convention (B, channel, num_points)
    assert tile_n % 8 == 0
    B, C, N = x.shape
    xt = jnp.transpose(x, (0, 2, 1)).astype(jnp.bfloat16)          # (B, N, 3)
    n_pad = pl.cdiv(N, tile_n) * tile_n
    if n_pad != N:                                                  # tail padding; masked in-kernel
        xt = jnp.pad(xt, ((0, 0), (0, n_pad - N), (0, 0)))

    # ---- STN3d: input transform --------------------------------------------
    stn = params["stn"]
    sfeat = mlp3_max(xt, N, stn["conv1"], stn["conv2"], stn["conv3"],
                     tile_n=tile_n)
    trans = fc_head(sfeat, stn["fc1"], stn["fc2"], stn["fc3_w"], stn["fc3_b"])
    trans = trans.reshape(B, C, C)                                  # (B, 3, 3)

    # ---- fused: bmm(x^T, trans) + conv1+bn1+relu + STNkd point MLP + max ----
    fstn = params["fstn"]
    h1, ffeat = tconv_fstn_max(xt, trans, N, params["conv1"],
                               fstn["conv1"], fstn["conv2"], fstn["conv3"],
                               tile_n=tile_n)                       # h1: (B, Npad, 64) bf16
    trans_feat = fc_head(ffeat, fstn["fc1"], fstn["fc2"],
                         fstn["fc3_w"], fstn["fc3_b"])
    trans_feat = trans_feat.reshape(B, 64, 64)

    # ---- feature transform (folded into conv2) + conv3 + global max pool ----
    feat = ftrans_mlp2_max(h1, trans_feat, N, params["conv2"], params["conv3"],
                           tile_n=tile_n)                           # (B, 1024)

    # ---- classifier head -----------------------------------------------------
    logits = fc_head(feat, params["fc1"], params["fc2"],
                     params["fc3_w"], params["fc3_b"])              # (B, num_class)
    return logits, feat


if __name__ == "__main__":
    key = jax.random.PRNGKey(0)
    pkey, xkey = jax.random.split(key)

    NUM_CLASS = 40
    B, C_IN, N_POINTS = 2, 3, 200   # channel=3 (normal_channel=False); N not a tile multiple

    params = init_params(pkey, num_class=NUM_CLASS, channel=C_IN)
    x = jax.random.normal(xkey, (B, C_IN, N_POINTS), dtype=jnp.float32)

    # tile_n=64 -> 4 N-tiles with a partial tail: exercises the max-accumulator
    # and the in-kernel padding mask.
    logits, feat = forward(params, x, tile_n=64)
    jax.block_until_ready((logits, feat))

    assert logits.shape == (B, NUM_CLASS)
    assert feat.shape == (B, 1024)
    assert bool(jnp.all(jnp.isfinite(logits)))
    assert bool(jnp.all(jnp.isfinite(feat)))
    print("KERNEL_OK")
</pallas_src>

<mosaic_0001>
module attributes {stable_mosaic.version = 11 : i64} {
  func.func @_mlp3_max_kernel(%arg0: i32, %arg1: i32, %arg2: memref<1x64x3xbf16, #tpu.memory_space<vmem>>, %arg3: memref<3x64xbf16, #tpu.memory_space<vmem>>, %arg4: memref<1x64xf32, #tpu.memory_space<vmem>>, %arg5: memref<1x64xf32, #tpu.memory_space<vmem>>, %arg6: memref<64x128xbf16, #tpu.memory_space<vmem>>, %arg7: memref<1x128xf32, #tpu.memory_space<vmem>>, %arg8: memref<1x128xf32, #tpu.memory_space<vmem>>, %arg9: memref<128x1024xbf16, #tpu.memory_space<vmem>>, %arg10: memref<1x1024xf32, #tpu.memory_space<vmem>>, %arg11: memref<1x1024xf32, #tpu.memory_space<vmem>>, %arg12: memref<1x1x1024xf32, #tpu.memory_space<vmem>>) attributes {dimension_semantics = [#tpu.dimension_semantics<parallel>, #tpu.dimension_semantics<arbitrary>], iteration_bounds = array<i64: 2, 4>, scalar_prefetch = 0 : i64, scratch_operands = 0 : i64, tpu.core_type = #tpu.core_type<tc>, window_params = [{transform_indices = @transform_0, window_bounds = array<i64: 1, 64, 3>}, {pipeline_mode = #tpu.pipeline_mode<synchronous>, transform_indices = @transform_1, window_bounds = array<i64: 3, 64>}, {pipeline_mode = #tpu.pipeline_mode<synchronous>, transform_indices = @transform_2, window_bounds = array<i64: 1, 64>}, {pipeline_mode = #tpu.pipeline_mode<synchronous>, transform_indices = @transform_3, window_bounds = array<i64: 1, 64>}, {pipeline_mode = #tpu.pipeline_mode<synchronous>, transform_indices = @transform_4, window_bounds = array<i64: 64, 128>}, {pipeline_mode = #tpu.pipeline_mode<synchronous>, transform_indices = @transform_5, window_bounds = array<i64: 1, 128>}, {pipeline_mode = #tpu.pipeline_mode<synchronous>, transform_indices = @transform_6, window_bounds = array<i64: 1, 128>}, {pipeline_mode = #tpu.pipeline_mode<synchronous>, transform_indices = @transform_7, window_bounds = array<i64: 128, 1024>}, {pipeline_mode = #tpu.pipeline_mode<synchronous>, transform_indices = @transform_8, window_bounds = array<i64: 1, 1024>}, {pipeline_mode = #tpu.pipeline_mode<synchronous>, transform_indices = @transform_9, window_bounds = array<i64: 1, 1024>}, {transform_indices = @transform_10, window_bounds = array<i64: 1, 1, 1024>}]} {
    %c0_i32 = arith.constant 0 : i32
    %0 = arith.cmpi eq, %arg1, %c0_i32 : i32
    %1 = arith.extui %0 : i1 to i32
    %c0_i32_0 = arith.constant 0 : i32
    %2 = arith.cmpi ne, %1, %c0_i32_0 : i32
    scf.if %2 {
      %cst_34 = arith.constant 0xFF800000 : f32
      %55 = vector.broadcast %cst_34 : f32 to vector<1x1x1024xf32>
      %c0_35 = arith.constant 0 : index
      %c0_36 = arith.constant 0 : index
      %c0_37 = arith.constant 0 : index
      %56 = vector.load %arg12[%c0_35, %c0_36, %c0_37] : memref<1x1x1024xf32, #tpu.memory_space<vmem>>, vector<1x1x1024xf32>
      tpu.vector_store %arg12[%c0_35, %c0_36, %c0_37], %55 {strides = array<i32>} : memref<1x1x1024xf32, #tpu.memory_space<vmem>>, vector<1x1x1024xf32>,
    } else {
    }
    %c0 = arith.constant 0 : index
    %c0_1 = arith.constant 0 : index
    %c0_2 = arith.constant 0 : index
    %3 = vector.load %arg2[%c0, %c0_1, %c0_2] : memref<1x64x3xbf16, #tpu.memory_space<vmem>>, vector<1x64x3xbf16>
    %4 = vector.shape_cast %3 : vector<1x64x3xbf16> to vector<64x3xbf16>
    %c0_3 = arith.constant 0 : index
    %c0_4 = arith.constant 0 : index
    %5 = vector.load %arg3[%c0_3, %c0_4] : memref<3x64xbf16, #tpu.memory_space<vmem>>, vector<3x64xbf16>
    %cst = arith.constant dense<0.000000e+00> : vector<64x64xf32>
    %6 = tpu.matmul %4, %5, %cst {dimension_numbers = #tpu.dot_dimension_numbers<[1], [0], [0], [1], [0, 0, 1, 1], [], []>} : vector<64x3xbf16>, vector<3x64xbf16>, vector<64x64xf32> -> vector<64x64xf32>
    %c0_5 = arith.constant 0 : index
    %c0_6 = arith.constant 0 : index
    %7 = vector.load %arg4[%c0_5, %c0_6] : memref<1x64xf32, #tpu.memory_space<vmem>>, vector<1x64xf32>
    %8 = vector.broadcast %7 : vector<1x64xf32> to vector<64x64xf32>
    %9 = arith.mulf %6, %8 : vector<64x64xf32>
    %c0_7 = arith.constant 0 : index
    %c0_8 = arith.constant 0 : index
    %10 = vector.load %arg5[%c0_7, %c0_8] : memref<1x64xf32, #tpu.memory_space<vmem>>, vector<1x64xf32>
    %11 = vector.broadcast %10 : vector<1x64xf32> to vector<64x64xf32>
    %12 = arith.addf %9, %11 : vector<64x64xf32>
    %cst_9 = arith.constant 0.000000e+00 : f32
    %13 = vector.broadcast %cst_9 : f32 to vector<64x64xf32>
    %14 = arith.maximumf %12, %13 : vector<64x64xf32>
    %15 = arith.truncf %14 : vector<64x64xf32> to vector<64x64xbf16>
    %c0_10 = arith.constant 0 : index
    %c0_11 = arith.constant 0 : index
    %16 = vector.load %arg6[%c0_10, %c0_11] : memref<64x128xbf16, #tpu.memory_space<vmem>>, vector<64x128xbf16>
    %cst_12 = arith.constant dense<0.000000e+00> : vector<64x128xf32>
    %17 = tpu.matmul %15, %16, %cst_12 {dimension_numbers = #tpu.dot_dimension_numbers<[1], [0], [0], [1], [0, 0, 1, 1], [], []>} : vector<64x64xbf16>, vector<64x128xbf16>, vector<64x128xf32> -> vector<64x128xf32>
    %c0_13 = arith.constant 0 : index
    %c0_14 = arith.constant 0 : index
    %18 = vector.load %arg7[%c0_13, %c0_14] : memref<1x128xf32, #tpu.memory_space<vmem>>, vector<1x128xf32>
    %19 = vector.broadcast %18 : vector<1x128xf32> to vector<64x128xf32>
    %20 = arith.mulf %17, %19 : vector<64x128xf32>
    %c0_15 = arith.constant 0 : index
    %c0_16 = arith.constant 0 : index
    %21 = vector.load %arg8[%c0_15, %c0_16] : memref<1x128xf32, #tpu.memory_space<vmem>>, vector<1x128xf32>
    %22 = vector.broadcast %21 : vector<1x128xf32> to vector<64x128xf32>
    %23 = arith.addf %20, %22 : vector<64x128xf32>
    %cst_17 = arith.constant 0.000000e+00 : f32
    %24 = vector.broadcast %cst_17 : f32 to vector<64x128xf32>
    %25 = arith.maximumf %23, %24 : vector<64x128xf32>
    %26 = arith.truncf %25 : vector<64x128xf32> to vector<64x128xbf16>
    %c0_18 = arith.constant 0 : index
    %c0_19 = arith.constant 0 : index
    %27 = vector.load %arg9[%c0_18, %c0_19] : memref<128x1024xbf16, #tpu.memory_space<vmem>>, vector<128x1024xbf16>
    %cst_20 = arith.constant dense<0.000000e+00> : vector<64x1024xf32>
    %28 = tpu.matmul %26, %27, %cst_20 {dimension_numbers = #tpu.dot_dimension_numbers<[1], [0], [0], [1], [0, 0, 1, 1], [], []>} : vector<64x128xbf16>, vector<128x1024xbf16>, vector<64x1024xf32> -> vector<64x1024xf32>
    %c0_21 = arith.constant 0 : index
    %c0_22 = arith.constant 0 : index
    %29 = vector.load %arg10[%c0_21, %c0_22] : memref<1x1024xf32, #tpu.memory_space<vmem>>, vector<1x1024xf32>
    %30 = vector.broadcast %29 : vector<1x1024xf32> to vector<64x1024xf32>
    %31 = arith.mulf %28, %30 : vector<64x1024xf32>
    %c0_23 = arith.constant 0 : index
    %c0_24 = arith.constant 0 : index
    %32 = vector.load %arg11[%c0_23, %c0_24] : memref<1x1024xf32, #tpu.memory_space<vmem>>, vector<1x1024xf32>
    %33 = vector.broadcast %32 : vector<1x1024xf32> to vector<64x1024xf32>
    %34 = arith.addf %31, %33 : vector<64x1024xf32>
    %cst_25 = arith.constant 0.000000e+00 : f32
    %35 = vector.broadcast %cst_25 : f32 to vector<64x1024xf32>
    %36 = arith.maximumf %34, %35 : vector<64x1024xf32>
    %37 = tpu.iota {dimensions = array<i32: 0>} : vector<64x1xi32>
    %c64_i32 = arith.constant 64 : i32
    %38 = arith.muli %arg1, %c64_i32 : i32
    %39 = vector.broadcast %38 : i32 to vector<64x1xi32>
    %40 = arith.addi %37, %39 : vector<64x1xi32>
    %c200_i32 = arith.constant 200 : i32
    %41 = vector.broadcast %c200_i32 : i32 to vector<64x1xi32>
    %42 = arith.cmpi slt, %40, %41 : vector<64x1xi32>
    %cst_26 = arith.constant 0xFF800000 : f32
    %43 = vector.shape_cast %42 : vector<64x1xi1> to vector<64x1xi1>
    %44 = vector.broadcast %43 : vector<64x1xi1> to vector<64x1024xi1>
    %45 = vector.broadcast %cst_26 : f32 to vector<64x1024xf32>
    %46 = arith.select %44, %36, %45 : vector<64x1024xi1>, vector<64x1024xf32>
    %c0_27 = arith.constant 0 : index
    %c0_28 = arith.constant 0 : index
    %c0_29 = arith.constant 0 : index
    %47 = vector.load %arg12[%c0_27, %c0_28, %c0_29] : memref<1x1x1024xf32, #tpu.memory_space<vmem>>, vector<1x1x1024xf32>
    %48 = vector.shape_cast %47 : vector<1x1x1024xf32> to vector<1x1024xf32>
    %cst_30 = arith.constant dense<0xFF800000> : vector<1024xf32>
    %49 = vector.multi_reduction <maximumf>, %46, %cst_30 [0] : vector<64x1024xf32> to vector<1024xf32>
    %50 = vector.shape_cast %49 : vector<1024xf32> to vector<1x1024xf32>
    %51 = arith.maximumf %48, %50 : vector<1x1024xf32>
    %c0_31 = arith.constant 0 : index
    %c0_32 = arith.constant 0 : index
    %c0_33 = arith.constant 0 : index
    %52 = vector.load %arg12[%c0_31, %c0_32, %c0_33] : memref<1x1x1024xf32, #tpu.memory_space<vmem>>, vector<1x1x1024xf32>
    %53 = vector.shape_cast %52 : vector<1x1x1024xf32> to vector<1x1024xf32>
    %54 = vector.shape_cast %51 : vector<1x1024xf32> to vector<1x1x1024xf32>
    tpu.vector_store %arg12[%c0_31, %c0_32, %c0_33], %54 {strides = array<i32>} : memref<1x1x1024xf32, #tpu.memory_space<vmem>>, vector<1x1x1024xf32>,
    return
  }
  func.func @transform_0(%arg0: i32, %arg1: i32) -> (i32, i32, i32) {
    %c0_i32 = arith.constant 0 : i32
    %c0_i32_0 = arith.constant 0 : i32
    return %arg0, %arg1, %c0_i32 : i32, i32, i32
  }
  func.func @transform_1(%arg0: i32, %arg1: i32) -> (i32, i32) {
    %c0_i32 = arith.constant 0 : i32
    %c0_i32_0 = arith.constant 0 : i32
    %c0_i32_1 = arith.constant 0 : i32
    return %c0_i32, %c0_i32_0 : i32, i32
  }
  func.func @transform_2(%arg0: i32, %arg1: i32) -> (i32, i32) {
    %c0_i32 = arith.constant 0 : i32
    %c0_i32_0 = arith.constant 0 : i32
    %c0_i32_1 = arith.constant 0 : i32
    return %c0_i32, %c0_i32_0 : i32, i32
  }
  func.func @transform_3(%arg0: i32, %arg1: i32) -> (i32, i32) {
    %c0_i32 = arith.constant 0 : i32
    %c0_i32_0 = arith.constant 0 : i32
    %c0_i32_1 = arith.constant 0 : i32
    return %c0_i32, %c0_i32_0 : i32, i32
  }
  func.func @transform_4(%arg0: i32, %arg1: i32) -> (i32, i32) {
    %c0_i32 = arith.constant 0 : i32
    %c0_i32_0 = arith.constant 0 : i32
    %c0_i32_1 = arith.constant 0 : i32
    return %c0_i32, %c0_i32_0 : i32, i32
  }
  func.func @transform_5(%arg0: i32, %arg1: i32) -> (i32, i32) {
    %c0_i32 = arith.constant 0 : i32
    %c0_i32_0 = arith.constant 0 : i32
    %c0_i32_1 = arith.constant 0 : i32
    return %c0_i32, %c0_i32_0 : i32, i32
  }
  func.func @transform_6(%arg0: i32, %arg1: i32) -> (i32, i32) {
    %c0_i32 = arith.constant 0 : i32
    %c0_i32_0 = arith.constant 0 : i32
    %c0_i32_1 = arith.constant 0 : i32
    return %c0_i32, %c0_i32_0 : i32, i32
  }
  func.func @transform_7(%arg0: i32, %arg1: i32) -> (i32, i32) {
    %c0_i32 = arith.constant 0 : i32
    %c0_i32_0 = arith.constant 0 : i32
    %c0_i32_1 = arith.constant 0 : i32
    return %c0_i32, %c0_i32_0 : i32, i32
  }
  func.func @transform_8(%arg0: i32, %arg1: i32) -> (i32, i32) {
    %c0_i32 = arith.constant 0 : i32
    %c0_i32_0 = arith.constant 0 : i32
    %c0_i32_1 = arith.constant 0 : i32
    return %c0_i32, %c0_i32_0 : i32, i32
  }
  func.func @transform_9(%arg0: i32, %arg1: i32) -> (i32, i32) {
    %c0_i32 = arith.constant 0 : i32
    %c0_i32_0 = arith.constant 0 : i32
    %c0_i32_1 = arith.constant 0 : i32
    return %c0_i32, %c0_i32_0 : i32, i32
  }
  func.func @transform_10(%arg0: i32, %arg1: i32) -> (i32, i32, i32) {
    %c0_i32 = arith.constant 0 : i32
    %c0_i32_0 = arith.constant 0 : i32
    %c0_i32_1 = arith.constant 0 : i32
    return %arg0, %c0_i32, %c0_i32_0 : i32, i32, i32
  }
}

</mosaic_0001>

<bundles_post_ra>
// kernel: tpu_custom_call.1
= control target key start
LH: loop header
LB: loop body
LE: loop exit
PB: predicated region body
PF: predicated region fallthrough
CT: control target
= control target key end

     0   :  { %15 = vsyncpa [#allocation3], 0  ;;  %s3170_s0 = inlined_call_operand.vmem [shape: bf16[2,256,3], index: 0, kind: input, shape index: {}]   ;;  %s3171_s1 = inlined_call_operand.vmem [shape: bf16[3,64], index: 1, kind: input, shape index: {}]   ;;  %s3172_s2 = inlined_call_operand.vmem [shape: f32[1,64], index: 2, kind: input, shape index: {}]   ;;  %s3173_s3 = inlined_call_operand.vmem [shape: f32[1,64], index: 3, kind: input, shape index: {}]   ;;  %s3174_s4 = inlined_call_operand.vmem [shape: bf16[64,128], index: 4, kind: input, shape index: {}]   ;;  %s3175_s5 = inlined_call_operand.vmem [shape: f32[1,128], index: 5, kind: input, shape index: {}]   ;;  %s3176_s6 = inlined_call_operand.vmem [shape: f32[1,128], index: 6, kind: input, shape index: {}]   ;;  %s3177_s7 = inlined_call_operand.hbm [shape: bf16[128,1024], index: 7, kind: input, shape index: {}]   ;;  %s3178_s8 = inlined_call_operand.vmem [shape: f32[1,1024], index: 8, kind: input, shape index: {}]   ;;  %s3179_s9 = inlined_call_operand.vmem [shape: f32[1,1024], index: 9, kind: input, shape index: {}]   ;;  %s3180_s10 = inlined_call_operand.hbm [shape: f32[2,1,1024], index: 10, kind: output, shape index: {}]  }
   0x1   :  { %16 = vsyncpa [#allocation4], 0 }
   0x2   :  { %18 = vsyncpa [#allocation4 + $0x1], 0  ;;  %s2471_s13 = smov 0   ;;  %s2473_s14 = smov 0  }
   0x3   :  { %s2475_s15 = smov 0   ;;  %s2477_s16 = smov 0  }
   0x4   :  { %s2479_s17 = smov 0   ;;  %s2481_s18 = smov 0  }
   0x5   :  { %s2483_s19 = smov 0   ;;  %s2485_s20 = smov 0  }
   0x6 LB: > { %3189 = sst [smem:[#allocation8_spill]] %s2398_s18  ;;  %s2042_s21 = sadd.s32 4294967295, %s2406_s20   ;;  %s2406_s20 = sphi %s2485_s20, %s24_s20   ;;  %s2402_s19 = sphi %s2483_s19, %s3208_s19   ;;  %s2398_s18 = sphi %s2481_s18, %s3207_s18   ;;  %s2394_s17 = sphi %s2479_s17, %s3206_s17   ;;  %s2390_s16 = sphi %s2477_s16, %s3205_s16   ;;  %s2386_s15 = sphi %s2475_s15, %s3211_s15   ;;  %s2382_s14 = sphi %s2473_s14, %s3210_s14   ;;  %s2378_s13 = sphi %s2471_s13, %s3209_s13  }
   0x7   : > { %3190 = sst [smem:[#allocation9_spill]] %s2402_s19  ;;  %s2043_s22 = sadd.s32 4294967294, %s2406_s20  }
   0x8   : > { %s33_s23 = sadd.s32 1, %s2398_s18  ;;  %s36_s24 = sadd.s32 1, %s2402_s19 }
   0x9   : > { %p34_p0 = scmp.ge.s32.totalorder %s33_s23, 4  ;;  %s260_s25 = sadd.s32 1, %s2386_s15 }
   0xa   : > { %p270_p1 = scmp.ne.s32.totalorder %s2386_s15, %s2382_s14  ;;  %p271_p2 = scmp.eq.s32.totalorder %s2042_s21, 7 }
   0xb   : > { %s3213_s23 = smov (%p34_p0, %s33_s23), 0  ;;  %s3215_s24 = smov (!%p34_p0, %s36_s24), %s2402_s19 }
   0xc   : > { %3191 = sst [smem:[#allocation10_spill]] %s3213_s23  ;;  %p2521_p3 = por %p271_p2, %p270_p1 }
   0xd   : > { %p276_p4 = scmp.ne.s32.totalorder %s2382_s14, %s2378_s13  ;;  %p38_p5 = scmp.ge.s32.totalorder %s3215_s24, 2 }
   0xe   : > { %s3192_s26 = scalar_select %p2521_p3, 1, 0 }
   0xf   : > { %p277_p6 = scmp.eq.s32.totalorder %s2043_s22, 7  ;;  %p2044_p7 = scmp.ge.s32.totalorder %s2406_s20, 1 }
  0x10   : > { %p284_p8 = scmp.lt.s32.totalorder %s2406_s20, 9  ;;  %s3217_s24 = smov (%p38_p5, %s3215_s24), 0 }
  0x11   : > { %3193 = sst [smem:[#allocation11_spill]] %s3217_s24  ;;  %p2531_p9 = por %p277_p6, %p276_p4 }
  0x12   : > { %p2535_p10 = pnand %p2044_p7, %p284_p8  ;;  %s257_s29 = ssub.s32 %s2402_s19, %s3217_s24 }
  0x13   : > { %s3194_s27 = scalar_select %p2531_p9, 1, 0 }
  0x14   : > { %s3195_s28 = scalar_select %p2535_p10, 1, 0 }
  0x15   : > { %p258_p11 = scmp.eq.s32.totalorder %s257_s29, 0  ;;  %p2190_p12 = pneg %p2535_p10 }
  0x16   : > { %p2543_p13 = scmp.eq.s32.totalorder %s2042_s21, 0  ;;  %s2408_s12 = smov [#allocation2]  }
  0x17   : > { %s2548_s11 = scalar_select %p258_p11, %s2386_s15, %s260_s25  }
  0x18   : > { %s3196_s30 = scalar_select %p2543_p13, 1, 0 }
  0x19   : > { %3197 = sst [smem:[#allocation12_spill]] %s2548_s11  ;;  %s314_s22 = sshll.u32 %s2408_s12, 4  ;;  %s315_s22 = int_to_ptr.vmem [resolvable:$true] %s314_s22 }
  0x1a   : > { %p2552_p0 = pnand %p2543_p13, %p2190_p12  ;;  %s2280_s19 = scalar_lea.hbm %s3177_s7, 8192 }
  0x1b   : > { %p2281_p1 = scmp.ne.s32.totalorder %s3177_s7, %s2280_s19  ;;  %p2287_p6 = scmp.lt.u32.totalorder %s2280_s19, %s3177_s7 }
  0x1c   : > { %p2282_p2 = pneg %p2552_p0 }
  0x1e   : > { %p2283_p4 = pnand %p2282_p2, %p2281_p1 }
  0x20   : > { %p2284_p5 = pneg %p2283_p4 }
  0x22   : > { %p2289_p7 = pnand %p2287_p6, %p2284_p5 }
  0x24   : > { %2292 = shalt.err (!%p2289_p7)
}
  0x25   : > { %s2293_s11 = scalar_lea.vmem %s315_s22, 8192  ;;  %p2301_p9 = scmp.lt.s32.totalorder %s315_s22, %s315_s22 }
  0x26   : > { %p2294_p8 = scmp.ne.s32.totalorder %s315_s22, %s2293_s11  ;;  %p2302_p3 = scmp.lt.s32.totalorder %s2293_s11, %s2293_s11 }
  0x28   : > { %p2296_p11 = pnand %p2294_p8, %p2282_p2  ;;  %p2303_p13 = por %p2302_p3, %p2301_p9 }
  0x2a   : > { %p2297_p12 = pneg %p2296_p11 }
  0x2c   : > { %p2304_p10 = pnand %p2303_p13, %p2297_p12 }
  0x2e   : > { %2307 = shalt.err (!%p2304_p10)
}
  0x2f   : > { %s2409_s18 = smov 512   ;;  %s2410_s24 = smov 32  }
  0x30   : > { %2193 = dma.hbm_to_vmem [thread:$0]  (!%p2552_p0), %s3177_s7, 8192, %s315_s22, [#allocation3], %s2409_s18, %s2409_s18, %s2410_s24  }
  0x31   : > { %p3199_p1 = scmp.ne.s32.totalorder %s3195_s28, 0 }
  0x32   : > { %p3200_p4 = scmp.ne.s32.totalorder (!%p3199_p1), %s3196_s30, 0 }
  0x33   : > { %349 = sbr.rel (%p3199_p1) target bundleno = 866 (0x362), region = 60 }
  0x3a   : > { %2369 = dma.done.wait (%p3200_p4), [#allocation3], 8192  }
  0x3b   : > { %2371 = vsyncadd (%p3200_p4), [#allocation3], 4294959104  ;;  %s3188_s19 = sand.u32 1, %s2382_s14   ;;  %s2050_s23 = sshll.u32 %s2390_s16, 3 }
  0x3c   : > { %s2049_s11 = sshll.u32 %s3188_s19, 3  ;;  %p392_p3 = scmp.lt.s32.totalorder %s2394_s17, 1 }
  0x3d   : > { %p394_p9 = scmp.lt.s32.totalorder %s2050_s23, 31  ;;  %s2587_s29 = scalar_lea.vmem [#allocation5], %s2049_s11 }
  0x3e   : > { %s393_s22 = scalar_select %p392_p3, %s2394_s17, 1 }
  0x3f   : > { %s3219_s23 = smov (!%p394_p9, %s2050_s23), 31  ;;  %p2053_p10 = scmp.ne.s32.totalorder %s2390_s16, 0 }
  0x40   : > { %s2051_s28 = sshll.u32 %s393_s22, 5  ;;  %v2411_v0 = vmov (!%p2053_p10), -inf  }
  0x41   : > { %s397_s25 = sadd.s32 %s2051_s28, %s3219_s23  ;;  %405 = sbr.rel (%p2053_p10) target bundleno = 72 (0x48), region = 68  ;;  %406 = vst [vmem:[%s2587_s29] sm:$0xff] (!%p2053_p10), %v2411_v0 }
  0x42   : > { %s2052_s12 = sshll.u32 %s397_s25, 2 }
  0x43   : > { %s399_s30 = scalar_lea.vmem %s3170_s0, %s2052_s12 }
  0x48 PF: > { %v415_v1 = vld [vmem:[%s3171_s1] sm:$0x3]  ;;  %vm449_vm0 = vcmask 1040384   ;;  %vm450_vm1 = vcmask 1041408   ;;  %v2412_v3 = vmov 65535   ;;  %vm436_vm2 = vcmask 23552  }
  0x49   : > { %v2272_v2 = vld [vmem:[%s399_s30] sm:$0xff]   ;;  %v451_v4 = vsel %vm449_vm0, 4294967295, %v2412_v3  ;;  %v2273_v7 = vld [vmem:[%s399_s30 + $0x8] sm:$0xff]   ;;  %v2274_v8 = vld [vmem:[%s399_s30 + $0x10] sm:$0xff]   ;;  %vm595_vm3 = vcmask 523264   ;;  %s2138_s25 = sshll.u32 %s2390_s16, 6 }
  0x4a   : > { %v452_v5 = vsel %vm450_vm1, %v451_v4, 0  ;;  %2160 = vmatprep.mubr.msk.bf16.mxu0 %vm436_vm2, %v2272_v2  ;;  %v2276_v9 = vld [vmem:[%s3174_s4] sm:$0xff]   ;;  %v2275_v10 = vld [vmem:[%s399_s30 + $0x18] sm:$0xff]   ;;  %v2277_v11 = vld [vmem:[%s3174_s4 + $0x8] sm:$0xff]   ;;  %s2144_s16 = sshll.u32 %s2394_s17, 7  ;;  %s1954_s21 = sshll.u32 %s2587_s29, 4  ;;  %s3116_s21 = int_to_ptr.vmem [resolvable:$true] %s1954_s21 }
  0x4b   : > { %v454_v6 = vand.u32 %v452_v5, %v415_v1  ;;  %2168 = vmatprep.subr.bf16.mxu1 %v2276_v9  ;;  %v2278_v12 = vld [vmem:[%s3174_s4 + $0x10] sm:$0xff]   ;;  %v2279_v13 = vld [vmem:[%s3174_s4 + $0x18] sm:$0xff]   ;;  %v2062_v42 = vld [vmem:[%s3172_s2] ss:$0 sm:$0xff]  ;;  %s3114_s19 = scalar_lea.hbm %s3180_s10, %s2144_s16  ;;  %s3201_s22 = sand.u32 1, %s2382_s14  }
  0x4c   : > { %2169 = vmatpush3.bf16.msra.mxu1 %v2276_v9  ;;  %v715_v14 = vld [vmem:[#allocation2] sm:$0xff]  ;;  %v2606_v16 = vld [vmem:[#allocation2 + $0x8] sm:$0xff]  ;;  %v2063_v44 = vld [vmem:[%s3173_s3] ss:$0 sm:$0xff]  ;;  %s1940_s28 = scalar_lea.sflag [#allocation4], %s3201_s22  ;;  %p3202_p0 = scmp.ne.s32.totalorder %s3192_s26, 0 }
  0x4d   : > { %2158 = vmatprep.subr.bf16.mxu0 %v454_v6  ;;  %2170 = vmatprep.subr.bf16.mxu1 %v2277_v11  ;;  %v719_v15 = vld [vmem:[#allocation2 + $0x20] sm:$0xff]  ;;  %v2608_v19 = vld [vmem:[#allocation2 + $0x28] sm:$0xff]  ;;  %s2415_s17 = smov [#allocation5]  }
  0x4e   : > { %2159 = vmatpush3.bf16.msra.mxu0 %v454_v6  ;;  %v2074_v17 = vcombine.low %v715_v14, %v719_v15  ;;  %v2075_v18 = vcombine.high %v715_v14, %v719_v15  ;;  %v723_v20 = vld [vmem:[#allocation2 + $0x40] sm:$0xff]  ;;  %v2076_v22 = vcombine.low %v2606_v16, %v2608_v19  ;;  %v2077_v23 = vcombine.high %v2606_v16, %v2608_v19  ;;  %v724_v61 = vld [vmem:[#allocation2 + $0x48] sm:$0xff]  ;;  %s2312_s12 = sshll.u32 %s2415_s17, 4  ;;  %s2313_s12 = int_to_ptr.vmem [resolvable:$false] %s2312_s12 }
  0x4f   : > { %v727_v21 = vld [vmem:[#allocation2 + $0x60] sm:$0xff]  ;;  %v728_v62 = vld [vmem:[#allocation2 + $0x68] sm:$0xff]  ;;  %s2314_s18 = scalar_lea.vmem %s2313_s12, 256  ;;  %p2315_p6 = scmp.lt.s32.totalorder %s3116_s21, %s2313_s12 }
  0x50   : > { %2171 = vmatpush3.bf16.msra.mxu1 %v2277_v11  ;;  %v2083_v24 = vcombine.high %v723_v20, %v727_v21  ;;  %v731_v25 = vld [vmem:[#allocation2 + $0x80] sm:$0xff]  ;;  %1099 = vmatprep.subr.bf16.mxu0 %v2075_v18  ;;  %v2082_v27 = vcombine.low %v723_v20, %v727_v21  ;;  %v732_v11 = vld [vmem:[#allocation2 + $0x88] sm:$0xff]  ;;  %v2084_v18 = vcombine.low %v724_v61, %v728_v62 }
  0x51   : > { %2161 = vmatmul.mubr.msk.bf16.vlgmr.msra.gmra.mrb[0].mxu0 %vm436_vm2, %v2273_v7  ;;  %2172 = vmatprep.subr.bf16.mxu1 %v2278_v12  ;;  %v735_v26 = vld [vmem:[#allocation2 + $0xa0] sm:$0xff] }
  0x52   : > { %2164 = vmatprep.mubr.msk.bf16.mxu0 %vm436_vm2, %v2274_v8  ;;  %1100 = vmatpush1.bf16.msra.mxu0 %v2074_v17  ;;  %v2091_v28 = vcombine.high %v731_v25, %v735_v26  ;;  %v739_v29 = vld [vmem:[#allocation2 + $0xc0] sm:$0xff]  ;;  %v2090_v31 = vcombine.low %v731_v25, %v735_v26  ;;  %v2085_v8 = vcombine.high %v724_v61, %v728_v62  ;;  %v744_v25 = vld [vmem:[#allocation2 + $0xe8] sm:$0xff]  ;;  %v2072_v61 = vld [vmem:[%s3175_s5] ss:$0 sm:$0xff] }
  0x53   : > { %1101 = vmatprep.subr.bf16.mxu0 %v2083_v24  ;;  %v743_v30 = vld [vmem:[#allocation2 + $0xe0] sm:$0xff]  ;;  %v740_v24 = vld [vmem:[#allocation2 + $0xc8] sm:$0xff] }
  0x54   : > { %2173 = vmatpush3.bf16.msra.mxu1 %v2278_v12  ;;  %v2099_v32 = vcombine.high %v739_v29, %v743_v30  ;;  %v747_v33 = vld [vmem:[#allocation2 + $0x100] sm:$0xff]  ;;  %v2098_v35 = vcombine.low %v739_v29, %v743_v30  ;;  %v736_v12 = vld [vmem:[#allocation2 + $0xa8] sm:$0xff]  ;;  %v2101_v29 = vcombine.high %v740_v24, %v744_v25  ;;  %v2100_v16 = vcombine.low %v740_v24, %v744_v25 }
  0x55   : > { %2174 = vmatprep.subr.bf16.mxu1 %v2279_v13  ;;  %v751_v34 = vld [vmem:[#allocation2 + $0x120] sm:$0xff]  ;;  %v2093_v21 = vcombine.high %v732_v11, %v736_v12  ;;  %v748_v30 = vld [vmem:[#allocation2 + $0x108] sm:$0xff] }
  0x56   : > { %1102 = vmatpush1.bf16.msra.mxu0 %v2082_v27  ;;  %v2107_v36 = vcombine.high %v747_v33, %v751_v34  ;;  %v755_v37 = vld [vmem:[#allocation2 + $0x140] sm:$0xff]  ;;  %v2106_v39 = vcombine.low %v747_v33, %v751_v34 }
  0x57   : > { %1103 = vmatprep.subr.bf16.mxu0 %v2091_v28  ;;  %v759_v38 = vld [vmem:[#allocation2 + $0x160] sm:$0xff]  ;;  %v2092_v28 = vcombine.low %v732_v11, %v736_v12  ;;  %v725_v11 = vld [vmem:[#allocation2 + $0x50] sm:$0xff] }
  0x58   : > { %2175 = vmatpush3.bf16.msra.mxu1 %v2279_v13  ;;  %v2115_v40 = vcombine.high %v755_v37, %v759_v38  ;;  %v2114_v41 = vcombine.low %v755_v37, %v759_v38  ;;  %v767_v37 = vld [vmem:[#allocation2 + $0x1a0] sm:$0xff] }
  0x59   : > { %2165 = vmatmul.mubr.msk.bf16.gmra.mrb[4].mxu0 %vm436_vm2, %v2275_v10  ;;  %1172 = vmatprep.subr.bf16.mxu1 %v2077_v23 }
  0x5a   : > { %1104 = vmatpush1.bf16.msra.mxu0 %v2090_v31  ;;  %v752_v31 = vld [vmem:[#allocation2 + $0x128] sm:$0xff] }
  0x5b   : > { %1105 = vmatprep.subr.bf16.mxu0 %v2099_v32  ;;  %v2109_v19 = vcombine.high %v748_v30, %v752_v31  ;;  %v760_v32 = vld [vmem:[#allocation2 + $0x168] sm:$0xff]  ;;  %v2108_v33 = vcombine.low %v748_v30, %v752_v31  ;;  %v733_v31 = vld [vmem:[#allocation2 + $0x90] sm:$0xff] }
  0x5e   : > { %1106 = vmatpush1.bf16.msra.mxu0 %v2098_v35 }
  0x5f   : > { %1107 = vmatprep.subr.bf16.mxu0 %v2107_v36  ;;  %v763_v36 = vld [vmem:[#allocation2 + $0x180] sm:$0xff] }
  0x60   : > { %v2123_v38 = vcombine.high %v763_v36, %v767_v37 }
  0x62   : > { %1108 = vmatpush1.bf16.msra.mxu0 %v2106_v39  ;;  %v764_v39 = vld [vmem:[#allocation2 + $0x188] sm:$0xff] }
  0x63   : > { %1109 = vmatprep.subr.bf16.mxu0 %v2115_v40  ;;  %v768_v40 = vld [vmem:[#allocation2 + $0x1a8] sm:$0xff] }
  0x66   : > { %1110 = vmatpush1.bf16.msra.mxu0 %v2114_v41  ;;  %v2122_v41 = vcombine.low %v763_v36, %v767_v37 }
  0x67   : > { %1111 = vmatprep.subr.bf16.mxu0 %v2123_v38 }
  0x6a   : > { %1112 = vmatpush1.bf16.msra.mxu0 %v2122_v41 }
 0x124   : > { %v2162_v43 = vpop.f32.mrb[0].mxu0 }
 0x125   : > { %v530_v45 = vmul.f32 %v2162_v43, %v2062_v42  ;;  %v490_v46 = vpop.f32.mrb[1].mxu0  ;;  %v2125_v43 = vcombine.high %v764_v39, %v768_v40 }
 0x126   : > { %v528_v47 = vmul.f32 %v2062_v42, %v490_v46  ;;  %v2163_v48 = vpop.f32.mrb[2].mxu0  ;;  %v772_v46 = vld [vmem:[#allocation2 + $0x1c8] sm:$0xff] }
 0x127   : > { %v545_v49 = vadd.f32 %v2063_v44, %v530_v45  ;;  %v531_v50 = vmul.f32 %v2163_v48, %v2062_v42  ;;  %v493_v51 = vpop.f32.mrb[3].mxu0  ;;  %v775_v45 = vld [vmem:[#allocation2 + $0x1e0] sm:$0xff]  ;;  %v776_v48 = vld [vmem:[#allocation2 + $0x1e8] sm:$0xff] }
 0x128   : > { %v543_v52 = vadd.f32 %v2063_v44, %v528_v47  ;;  %v529_v53 = vmul.f32 %v2062_v42, %v493_v51  ;;  %v2133_v51 = vcombine.high %v772_v46, %v776_v48 }
 0x129   : > { %v546_v54 = vadd.f32 %v2063_v44, %v531_v50  ;;  %v553_v56 = vmax.f32 %v545_v49, 0.0  ;;  %v2132_v50 = vcombine.low %v772_v46, %v776_v48  ;;  %v742_v48 = vld [vmem:[#allocation2 + $0xd8] sm:$0xff] }
 0x12a   : > { %v544_v55 = vadd.f32 %v2063_v44, %v529_v53  ;;  %v551_v58 = vmax.f32 %v543_v52, 0.0  ;;  %v717_v52 = vld [vmem:[#allocation2 + $0x10] sm:$0xff] }
 0x12b   : > { %v554_v57 = vmax.f32 %v546_v54, 0.0  ;;  %v721_v53 = vld [vmem:[#allocation2 + $0x30] sm:$0xff]  ;;  %v718_v54 = vld [vmem:[#allocation2 + $0x18] sm:$0xff] }
 0x12c   : > { %v552_v59 = vmax.f32 %v544_v55, 0.0  ;;  %v2166_v60 = vpop.f32.mrb[4].mxu0  ;;  %v2079_v55 = vcombine.high %v717_v52, %v721_v53 }
 0x12d   : > { %v560_v63 = vpack.c.bf16 %v554_v57, %v553_v56  ;;  %v534_v0 = vmul.f32 %v2166_v60, %v2062_v42  ;;  %v506_v1 = vpop.f32.mrb[5].mxu0  ;;  %v722_v56 = vld [vmem:[#allocation2 + $0x38] sm:$0xff]  ;;  %v2413_v57 = vmov 0  }
 0x12e   : > { %v532_v2 = vmul.f32 %v2062_v42, %v506_v1  ;;  %v2167_v3 = vpop.f32.mrb[6].mxu0  ;;  %v559_v4 = vpack.c.bf16 %v552_v59, %v551_v58  ;;  %1131 = vmatprep.mubr.bf16.mxu0 %v2413_v57  ;;  %v2078_v58 = vcombine.low %v717_v52, %v721_v53  ;;  %v2080_v59 = vcombine.low %v718_v54, %v722_v56 }
 0x12f   : > { %v549_v5 = vadd.f32 %v2063_v44, %v534_v0  ;;  %v535_v6 = vmul.f32 %v2167_v3, %v2062_v42  ;;  %v509_v7 = vpop.f32.mrb[7].mxu0  ;;  %v2081_v60 = vcombine.high %v718_v54, %v722_v56 }
 0x130   : > { %v547_v9 = vadd.f32 %v2063_v44, %v532_v2  ;;  %v533_v10 = vmul.f32 %v2062_v42, %v509_v7  ;;  %2176 = vmatprep.mubr.msk.bf16.mxu1 %vm595_vm3, %v559_v4  ;;  %v2124_v42 = vcombine.low %v764_v39, %v768_v40 }
 0x131   : > { %v557_v13 = vmax.f32 %v549_v5, 0.0  ;;  %v550_v14 = vadd.f32 %v2063_v44, %v535_v6  ;;  %2177 = vmatmul.mubr.msk.bf16.vlgmr.msra.gmra.mrb[0].mxu1 %vm595_vm3, %v560_v63  ;;  %v2073_v63 = vld [vmem:[%s3176_s6] ss:$0 sm:$0xff] }
 0x132   : > { %v555_v15 = vmax.f32 %v547_v9, 0.0  ;;  %v548_v17 = vadd.f32 %v2063_v44, %v533_v10  ;;  %1173 = vmatpush1.bf16.msra.mxu1 %v2076_v22  ;;  %v756_v22 = vld [vmem:[#allocation2 + $0x148] sm:$0xff]  ;;  %v771_v44 = vld [vmem:[#allocation2 + $0x1c0] sm:$0xff] }
 0x133   : > { %v558_v20 = vmax.f32 %v550_v14, 0.0  ;;  %1174 = vmatprep.subr.bf16.mxu1 %v2085_v8  ;;  %v2117_v34 = vcombine.high %v756_v22, %v760_v32  ;;  %v2116_v35 = vcombine.low %v756_v22, %v760_v32  ;;  %v2131_v47 = vcombine.high %v771_v44, %v775_v45  ;;  %v729_v14 = vld [vmem:[#allocation2 + $0x70] sm:$0xff] }
 0x134   : > { %v556_v23 = vmax.f32 %v548_v17, 0.0  ;;  %v2130_v49 = vcombine.low %v771_v44, %v775_v45  ;;  %v730_v17 = vld [vmem:[#allocation2 + $0x78] sm:$0xff]  ;;  %v737_v32 = vld [vmem:[#allocation2 + $0xb0] sm:$0xff]  ;;  %v2086_v39 = vcombine.low %v725_v11, %v729_v14 }
 0x135   : > { %v562_v26 = vpack.c.bf16 %v558_v20, %v557_v13  ;;  %1113 = vmatprep.subr.bf16.mxu0 %v2131_v47  ;;  %v741_v45 = vld [vmem:[#allocation2 + $0xd0] sm:$0xff]  ;;  %v2094_v52 = vcombine.low %v733_v31, %v737_v32 }
 0x136   : > { %v561_v27 = vpack.c.bf16 %v556_v23, %v555_v15  ;;  %1175 = vmatpush1.bf16.msra.mxu1 %v2084_v18  ;;  %1114 = vmatpush1.bf16.msra.mxu0 %v2130_v49  ;;  %v726_v15 = vld [vmem:[#allocation2 + $0x58] sm:$0xff]  ;;  %v745_v47 = vld [vmem:[#allocation2 + $0xf0] sm:$0xff] }
 0x137   : > { %1176 = vmatprep.subr.bf16.mxu1 %v2093_v21  ;;  %1245 = vmatprep.subr.bf16.mxu0 %v2079_v55  ;;  %v2089_v30 = vcombine.high %v726_v15, %v730_v17  ;;  %v2088_v40 = vcombine.low %v726_v15, %v730_v17  ;;  %v746_v49 = vld [vmem:[#allocation2 + $0xf8] sm:$0xff]  ;;  %v2103_v55 = vcombine.high %v741_v45, %v745_v47 }
 0x138   : > { %2180 = vmatprep.mubr.msk.bf16.mxu1 %vm595_vm3, %v561_v27  ;;  %v2105_v56 = vcombine.high %v742_v48, %v746_v49 }
 0x139   : > { %2181 = vmatmul.mubr.msk.bf16.gmra.mrb[4].mxu1 %vm595_vm3, %v562_v26 }
 0x13a   : > { %1177 = vmatpush1.bf16.msra.mxu1 %v2092_v28  ;;  %1204 = vmatprep.mubr.bf16.mxu1 %v2413_v57 }
 0x13b   : > { %1178 = vmatprep.subr.bf16.mxu1 %v2101_v29  ;;  %v2087_v29 = vcombine.high %v725_v11, %v729_v14  ;;  %v769_v11 = vld [vmem:[#allocation2 + $0x1b0] sm:$0xff] }
 0x13e   : > { %1179 = vmatpush1.bf16.msra.mxu1 %v2100_v16 }
 0x13f   : > { %1180 = vmatprep.subr.bf16.mxu1 %v2109_v19 }
 0x142   : > { %1181 = vmatpush1.bf16.msra.mxu1 %v2108_v33  ;;  %v734_v33 = vld [vmem:[#allocation2 + $0x98] sm:$0xff] }
 0x143   : > { %1182 = vmatprep.subr.bf16.mxu1 %v2117_v34  ;;  %v738_v34 = vld [vmem:[#allocation2 + $0xb8] sm:$0xff] }
 0x144   : > { %v2097_v44 = vcombine.high %v734_v33, %v738_v34  ;;  %v2096_v53 = vcombine.low %v734_v33, %v738_v34 }
 0x146   : > { %1183 = vmatpush1.bf16.msra.mxu1 %v2116_v35 }
 0x147   : > { %1184 = vmatprep.subr.bf16.mxu1 %v2125_v43  ;;  %v2095_v43 = vcombine.high %v733_v31, %v737_v32  ;;  %v1391_v32 = vld [vmem:[%s3178_s8] sm:$0xff] }
 0x14a   : > { %1185 = vmatpush1.bf16.msra.mxu1 %v2124_v42 }
 0x14b   : > { %1186 = vmatprep.subr.bf16.mxu1 %v2133_v51 }
 0x14e   : > { %1187 = vmatpush1.bf16.msra.mxu1 %v2132_v50 }
 0x14f   : > { %1318 = vmatprep.subr.bf16.mxu1 %v2081_v60  ;;  %v750_v60 = vld [vmem:[#allocation2 + $0x118] sm:$0xff] }
 0x204   : > { %v2178_v62 = vpop.f32.mrb[0].mxu1 }
 0x205   : > { %v682_v0 = vmul.f32 %v2178_v62, %v2072_v61  ;;  %v642_v1 = vpop.f32.mrb[1].mxu1  ;;  %v2102_v62 = vcombine.low %v741_v45, %v745_v47 }
 0x206   : > { %v680_v2 = vmul.f32 %v2072_v61, %v642_v1  ;;  %v2179_v3 = vpop.f32.mrb[2].mxu1 }
 0x207   : > { %v697_v4 = vadd.f32 %v2073_v63, %v682_v0  ;;  %v683_v5 = vmul.f32 %v2179_v3, %v2072_v61  ;;  %v645_v6 = vpop.f32.mrb[3].mxu1  ;;  %v761_v3 = vld [vmem:[#allocation2 + $0x170] sm:$0xff] }
 0x208   : > { %v695_v7 = vadd.f32 %v2073_v63, %v680_v2  ;;  %v681_v8 = vmul.f32 %v2072_v61, %v645_v6  ;;  %v757_v2 = vld [vmem:[#allocation2 + $0x150] sm:$0xff] }
 0x209   : > { %v698_v9 = vadd.f32 %v2073_v63, %v683_v5  ;;  %v705_v12 = vmax.f32 %v697_v4, 0.0  ;;  %v758_v4 = vld [vmem:[#allocation2 + $0x158] sm:$0xff]  ;;  %v2118_v14 = vcombine.low %v757_v2, %v761_v3 }
 0x20a   : > { %v696_v10 = vadd.f32 %v2073_v63, %v681_v8  ;;  %v703_v18 = vmax.f32 %v695_v7, 0.0  ;;  %v762_v5 = vld [vmem:[#allocation2 + $0x178] sm:$0xff]  ;;  %v2119_v8 = vcombine.high %v757_v2, %v761_v3 }
 0x20b   : > { %v706_v13 = vmax.f32 %v698_v9, 0.0  ;;  %v2121_v9 = vcombine.high %v758_v4, %v762_v5  ;;  %v2120_v15 = vcombine.low %v758_v4, %v762_v5 }
 0x20c   : > { %v704_v20 = vmax.f32 %v696_v10, 0.0  ;;  %v2182_v21 = vpop.f32.mrb[4].mxu1  ;;  %v765_v10 = vld [vmem:[#allocation2 + $0x190] sm:$0xff] }
 0x20d   : > { %v2635_v23 = vpack.c.bf16 %v706_v13, %v705_v12  ;;  %v686_v24 = vmul.f32 %v2182_v21, %v2072_v61  ;;  %v658_v25 = vpop.f32.mrb[5].mxu1  ;;  %v766_v12 = vld [vmem:[#allocation2 + $0x198] sm:$0xff]  ;;  %v2127_v17 = vcombine.high %v765_v10, %v769_v11  ;;  %v777_v21 = vld [vmem:[#allocation2 + $0x1f0] sm:$0xff] }
 0x20e   : > { %v2637_v26 = vpack.c.bf16 %v704_v20, %v703_v18  ;;  %v684_v27 = vmul.f32 %v2072_v61, %v658_v25  ;;  %v2183_v28 = vpop.f32.mrb[6].mxu1  ;;  %v770_v13 = vld [vmem:[#allocation2 + $0x1b8] sm:$0xff]  ;;  %v773_v20 = vld [vmem:[#allocation2 + $0x1d0] sm:$0xff] }
 0x20f   : > { %v701_v16 = vadd.f32 %v2073_v63, %v686_v24  ;;  %v687_v19 = vmul.f32 %v2183_v28, %v2072_v61  ;;  %v661_v22 = vpop.f32.mrb[7].mxu1  ;;  %v2129_v18 = vcombine.high %v766_v12, %v770_v13  ;;  %v774_v24 = vld [vmem:[#allocation2 + $0x1d8] sm:$0xff]  ;;  %v2128_v28 = vcombine.low %v766_v12, %v770_v13 }
 0x210   : > { %v699_v35 = vadd.f32 %v2073_v63, %v684_v27  ;;  %v685_v36 = vmul.f32 %v2072_v61, %v661_v22  ;;  %1132 = vmatmul.mubr.bf16.vlgmr.msra.gmra.mrb[8].mxu0 %v2637_v26  ;;  %1205 = vmatmul.mubr.bf16.vlgmr.msra.gmra.mrb[8].mxu1 %v2637_v26  ;;  %v754_v61 = vld [vmem:[#allocation2 + $0x138] sm:$0xff]  ;;  %v2126_v27 = vcombine.low %v765_v10, %v769_v11 }
 0x211   : > { %v709_v37 = vmax.f32 %v701_v16, 0.0  ;;  %v702_v38 = vadd.f32 %v2073_v63, %v687_v19  ;;  %1246 = vmatpush1.bf16.msra.mxu0 %v2078_v58  ;;  %1319 = vmatpush1.bf16.msra.mxu1 %v2080_v59  ;;  %v749_v58 = vld [vmem:[#allocation2 + $0x110] sm:$0xff]  ;;  %v2113_v1 = vcombine.high %v750_v60, %v754_v61  ;;  %v2112_v7 = vcombine.low %v750_v60, %v754_v61  ;;  %v778_v25 = vld [vmem:[#allocation2 + $0x1f8] sm:$0xff] }
 0x212   : > { %v707_v41 = vmax.f32 %v699_v35, 0.0  ;;  %v700_v42 = vadd.f32 %v2073_v63, %v685_v36  ;;  %1247 = vmatprep.subr.bf16.mxu0 %v2087_v29  ;;  %1320 = vmatprep.subr.bf16.mxu1 %v2089_v30  ;;  %v753_v59 = vld [vmem:[#allocation2 + $0x130] sm:$0xff]  ;;  %v2104_v63 = vcombine.low %v742_v48, %v746_v49  ;;  %v2135_v29 = vcombine.high %v773_v20, %v777_v21 }
 0x213   : > { %v710_v46 = vmax.f32 %v702_v38, 0.0  ;;  %1141 = vmatprep.mubr.bf16.mxu0 %v2413_v57  ;;  %1214 = vmatprep.mubr.bf16.mxu1 %v2413_v57  ;;  %v2111_v0 = vcombine.high %v749_v58, %v753_v59  ;;  %v2110_v6 = vcombine.low %v749_v58, %v753_v59  ;;  %v2137_v30 = vcombine.high %v774_v24, %v778_v25  ;;  %v1497_v38 = vld [vmem:[%s3179_s9] sm:$0xff] }
 0x214   : > { %v708_v50 = vmax.f32 %v700_v42, 0.0  ;;  %v2134_v31 = vcombine.low %v773_v20, %v777_v21  ;;  %v2136_v16 = vcombine.low %v774_v24, %v778_v25  ;;  %v1677_v36 = vstv %s2138_s25  ;;  %s2308_s25 = scalar_lea.vmem %s3116_s21, 128 }
 0x215   : > { %v2643_v51 = vpack.c.bf16 %v710_v46, %v709_v37  ;;  %1248 = vmatpush1.bf16.msra.mxu0 %v2086_v39  ;;  %1321 = vmatpush1.bf16.msra.mxu1 %v2088_v40  ;;  %v2414_v46 = vmov 1966171168   ;;  %p2309_p13 = scmp.ne.s32.totalorder %s3116_s21, %s2308_s25  ;;  %p2316_p7 = scmp.lt.s32.totalorder %s2314_s18, %s2308_s25 }
 0x216   : > { %v2645_v54 = vpack.c.bf16 %v708_v50, %v707_v41  ;;  %1249 = vmatprep.subr.bf16.mxu0 %v2095_v43  ;;  %1322 = vmatprep.subr.bf16.mxu1 %v2097_v44  ;;  %v1892_v47 = vunpack.c.l.s4 %v2414_v46 }
 0x217   : > { %p2310_p2 = pnand %p2309_p13, %p3202_p0  ;;  %p2317_p8 = por %p2316_p7, %p2315_p6 }
 0x218   : > { %1142 = vmatmul.mubr.bf16.gmra.mrb[12].mxu0 %v2635_v23  ;;  %1215 = vmatmul.mubr.bf16.gmra.mrb[12].mxu1 %v2635_v23 }
 0x219   : > { %1250 = vmatpush1.bf16.msra.mxu0 %v2094_v52  ;;  %1323 = vmatpush1.bf16.msra.mxu1 %v2096_v53  ;;  %p2311_p5 = pneg %p2310_p2 }
 0x21a   : > { %1251 = vmatprep.subr.bf16.mxu0 %v2103_v55  ;;  %1324 = vmatprep.subr.bf16.mxu1 %v2105_v56 }
 0x21b   : > { %1151 = vmatprep.mubr.bf16.mxu0 %v2413_v57  ;;  %1224 = vmatprep.mubr.bf16.mxu1 %v2413_v57  ;;  %p2318_p11 = pnand %p2317_p8, %p2311_p5 }
 0x21d   : > { %1252 = vmatpush1.bf16.msra.mxu0 %v2102_v62  ;;  %1325 = vmatpush1.bf16.msra.mxu1 %v2104_v63  ;;  %v1893_v63 = vunpack.c.0.s8 %v1892_v47 }
 0x21e   : > { %1253 = vmatprep.subr.bf16.mxu0 %v2111_v0  ;;  %1326 = vmatprep.subr.bf16.mxu1 %v2113_v1 }
 0x220   : > { %1152 = vmatmul.mubr.bf16.gmra.mrb[16].mxu0 %v2645_v54  ;;  %1225 = vmatmul.mubr.bf16.gmra.mrb[16].mxu1 %v2645_v54 }
 0x221   : > { %1254 = vmatpush1.bf16.msra.mxu0 %v2110_v6  ;;  %1327 = vmatpush1.bf16.msra.mxu1 %v2112_v7 }
 0x222   : > { %1255 = vmatprep.subr.bf16.mxu0 %v2119_v8  ;;  %1328 = vmatprep.subr.bf16.mxu1 %v2121_v9 }
 0x223   : > { %1161 = vmatprep.mubr.bf16.mxu0 %v2413_v57  ;;  %1234 = vmatprep.mubr.bf16.mxu1 %v2413_v57 }
 0x225   : > { %1256 = vmatpush1.bf16.msra.mxu0 %v2118_v14  ;;  %1329 = vmatpush1.bf16.msra.mxu1 %v2120_v15 }
 0x226   : > { %1257 = vmatprep.subr.bf16.mxu0 %v2127_v17  ;;  %1330 = vmatprep.subr.bf16.mxu1 %v2129_v18 }
 0x228   : > { %1162 = vmatmul.mubr.bf16.gmra.mrb[20].mxu0 %v2643_v51  ;;  %1235 = vmatmul.mubr.bf16.gmra.mrb[20].mxu1 %v2643_v51 }
 0x229   : > { %1258 = vmatpush1.bf16.msra.mxu0 %v2126_v27  ;;  %1331 = vmatpush1.bf16.msra.mxu1 %v2128_v28 }
 0x22a   : > { %1259 = vmatprep.subr.bf16.mxu0 %v2135_v29  ;;  %1332 = vmatprep.subr.bf16.mxu1 %v2137_v30 }
 0x22b   : > { %1277 = vmatprep.mubr.bf16.mxu0 %v2413_v57  ;;  %1350 = vmatprep.mubr.bf16.mxu1 %v2413_v57 }
 0x22d   : > { %1260 = vmatpush1.bf16.msra.mxu0 %v2134_v31  ;;  %1333 = vmatpush1.bf16.msra.mxu1 %v2136_v16 }
 0x230   : > { %1278 = vmatmul.mubr.bf16.vlgmr.msra.gmra.mrb[24].mxu0 %v2637_v26  ;;  %1351 = vmatmul.mubr.bf16.vlgmr.msra.gmra.mrb[24].mxu1 %v2637_v26  ;;  %v1393_v26 = vlaneseq }
 0x231   : > { %1287 = vmatprep.mubr.bf16.mxu0 %v2413_v57  ;;  %1360 = vmatprep.mubr.bf16.mxu1 %v2413_v57 }
 0x232   : > { %v1394_v19 = vshrl.u32 %v1393_v26, 7 }
 0x234   : > { %v1403_v22 = vsub.s32 2, %v1394_v19  ;;  %v1399_v33 = vsub.s32 1, %v1394_v19  ;;  %v1407_v34 = vsub.s32 3, %v1394_v19  ;;  %v1669_v35 = vadd.s32 8, %v1394_v19 }
 0x235   : > { %v2684_v39 = vadd.s32 %v1677_v36, %v1394_v19  ;;  %v1670_v43 = vadd.s32 16, %v1394_v19  ;;  %v1671_v44 = vadd.s32 24, %v1394_v19  ;;  %v1672_v45 = vadd.s32 32, %v1394_v19 }
 0x236   : > { %v2686_v40 = vrot.slane %v1391_v32, %v1399_v33  ;;  %v2688_v41 = vrot.slane %v1391_v32, %v1407_v34  ;;  %v2690_v42 = vadd.s32 %v1677_v36, %v1669_v35  ;;  %v1673_v48 = vadd.s32 40, %v1394_v19 }
 0x237   : > { %v1674_v49 = vadd.s32 48, %v1394_v19  ;;  %v1675_v50 = vadd.s32 56, %v1394_v19  ;;  %v2694_v53 = vrot.slane %v1497_v38, %v1403_v22  ;;  %v1415_v55 = vsub.s32 5, %v1394_v19 }
 0x238   : > { %1288 = vmatmul.mubr.bf16.gmra.mrb[28].mxu0 %v2635_v23  ;;  %1361 = vmatmul.mubr.bf16.gmra.mrb[28].mxu1 %v2635_v23  ;;  %v1395_v23 = vsub.s32 0, %v1394_v19  ;;  %vm1686_vm4 = vcmp.lt.s32.totalorder %v2684_v39, 200  ;;  %v2697_v56 = vrot.slane %v1497_v38, %v1399_v33  ;;  %v2699_v58 = vrot.slane %v1497_v38, %v1407_v34 }
 0x239   : > { %1297 = vmatprep.mubr.bf16.mxu0 %v2413_v57  ;;  %1370 = vmatprep.mubr.bf16.mxu1 %v2413_v57  ;;  %v1423_v59 = vsub.s32 7, %v1394_v19  ;;  %vm1687_vm5 = vcmp.lt.s32.totalorder %v2690_v42, 200  ;;  %v2702_v60 = vadd.s32 %v1677_v36, %v1670_v43  ;;  %v2704_v61 = vadd.s32 %v1677_v36, %v1671_v44 }
 0x23a   : > { %v2677_v37 = vrot.slane %v1391_v32, %v1395_v23  ;;  %v2692_v52 = vrot.slane %v1497_v38, %v1395_v23  ;;  %v2706_v62 = vadd.s32 %v1677_v36, %v1672_v45  ;;  %v2708_v0 = vadd.s32 %v1677_v36, %v1673_v48 }
 0x23b   : > { %v2710_v1 = vadd.s32 %v1677_v36, %v1674_v49  ;;  %v2712_v2 = vadd.s32 %v1677_v36, %v1675_v50  ;;  %v2722_v9 = vrot.slane %v1391_v32, %v1415_v55  ;;  %v2726_v14 = vrot.slane %v1497_v38, %v1415_v55 }
 0x23c   : > { %v2728_v15 = vrot.slane %v1391_v32, %v1423_v59  ;;  %v2732_v24 = vrot.slane %v1497_v38, %v1423_v59  ;;  %v2734_v25 = vsub.s32 %v1893_v63, %v1394_v19  ;;  %vm1688_vm6 = vcmp.lt.s32.totalorder %v2702_v60, 200 }
 0x23d   : > { %vm1689_vm7 = vcmp.lt.s32.totalorder %v2704_v61, 200  ;;  %vm1690_vm8 = vcmp.lt.s32.totalorder %v2706_v62, 200  ;;  %vm1691_vm9 = vcmp.lt.s32.totalorder %v2708_v0, 200  ;;  %vm1692_vm10 = vcmp.lt.s32.totalorder %v2710_v1, 200 }
 0x23e   : > { %vm1693_vm11 = vcmp.lt.s32.totalorder %v2712_v2, 200 }
 0x240   : > { %1298 = vmatmul.mubr.bf16.gmra.mrb[32].mxu0 %v2645_v54  ;;  %1371 = vmatmul.mubr.bf16.gmra.mrb[32].mxu1 %v2645_v54  ;;  %v1419_v54 = vsub.s32 6, %v1394_v19 }
 0x241   : > { %1307 = vmatprep.mubr.bf16.mxu0 %v2413_v57  ;;  %1380 = vmatprep.mubr.bf16.mxu1 %v2413_v57  ;;  %v2679_v57 = vrot.slane %v1391_v32, %v1403_v22 }
 0x242   : > { %v2718_v7 = vrot.slane %v1391_v32, %v1419_v54  ;;  %v2720_v8 = vrot.slane %v1497_v38, %v1419_v54 }
 0x248   : > { %1308 = vmatmul.mubr.bf16.gmra.mrb[36].mxu0 %v2643_v51  ;;  %1381 = vmatmul.mubr.bf16.gmra.mrb[36].mxu1 %v2643_v51  ;;  %v1411_v51 = vsub.s32 4, %v1394_v19 }
 0x24a   : > { %v2714_v3 = vrot.slane %v1391_v32, %v1411_v51  ;;  %v2716_v6 = vrot.slane %v1497_v38, %v1411_v51 }
 0x2e3   : > { %v1133_v4 = vpop.f32.mrb[8].mxu0  ;;  %v1206_v5 = vpop.f32.mrb[8].mxu1 }
 0x2e4   : > { %v1433_v10 = vmul.f32 %v2677_v37, %v1133_v4  ;;  %v1435_v11 = vmul.f32 %v2679_v57, %v1206_v5  ;;  %v1135_v12 = vpop.f32.mrb[9].mxu0  ;;  %v1208_v13 = vpop.f32.mrb[9].mxu1 }
 0x2e5   : > { %v1434_v17 = vmul.f32 %v2686_v40, %v1135_v12  ;;  %v1436_v18 = vmul.f32 %v2688_v41, %v1208_v13  ;;  %v1137_v20 = vpop.f32.mrb[10].mxu0  ;;  %v1210_v21 = vpop.f32.mrb[10].mxu1 }
 0x2e6   : > { %v1539_v27 = vadd.f32 %v2692_v52, %v1433_v10  ;;  %v1541_v28 = vadd.f32 %v2694_v53, %v1435_v11  ;;  %v1441_v29 = vmul.f32 %v2677_v37, %v1137_v20  ;;  %v1443_v30 = vmul.f32 %v2679_v57, %v1210_v21  ;;  %v1139_v31 = vpop.f32.mrb[11].mxu0  ;;  %v1212_v16 = vpop.f32.mrb[11].mxu1 }
 0x2e7   : > { %v1540_v26 = vadd.f32 %v2697_v56, %v1434_v17  ;;  %v1542_v23 = vadd.f32 %v2699_v58, %v1436_v18  ;;  %v1442_v22 = vmul.f32 %v2686_v40, %v1139_v31  ;;  %v1444_v32 = vmul.f32 %v2688_v41, %v1212_v16 }
 0x2e8   : > { %v1603_v19 = vmax.f32 %v1539_v27, 0.0  ;;  %v1605_v33 = vmax.f32 %v1541_v28, 0.0  ;;  %v1547_v34 = vadd.f32 %v2692_v52, %v1441_v29  ;;  %v1549_v35 = vadd.f32 %v2694_v53, %v1443_v30 }
 0x2e9   : > { %v1604_v36 = vmax.f32 %v1540_v26, 0.0  ;;  %v1606_v38 = vmax.f32 %v1542_v23, 0.0  ;;  %v1548_v43 = vadd.f32 %v2697_v56, %v1442_v22  ;;  %v1550_v44 = vadd.f32 %v2699_v58, %v1444_v32 }
 0x2ea   : > { %v1710_v45 = vsel %vm1686_vm4, %v1603_v19, -inf  ;;  %v1712_v46 = vsel %vm1686_vm4, %v1605_v33, -inf  ;;  %v1611_v47 = vmax.f32 %v1547_v34, 0.0  ;;  %v1613_v48 = vmax.f32 %v1549_v35, 0.0 }
 0x2eb   : > { %v1711_v49 = vsel %vm1686_vm4, %v1604_v36, -inf  ;;  %v1713_v50 = vsel %vm1686_vm4, %v1606_v38, -inf  ;;  %v1612_v51 = vmax.f32 %v1548_v43, 0.0  ;;  %v1614_v54 = vmax.f32 %v1550_v44, 0.0  ;;  %v1143_v55 = vpop.f32.mrb[12].mxu0  ;;  %v1216_v59 = vpop.f32.mrb[12].mxu1 }
 0x2ec   : > { %v1718_v63 = vsel %vm1687_vm5, %v1611_v47, -inf  ;;  %v1720_v4 = vsel %vm1687_vm5, %v1613_v48, -inf  ;;  %v1449_v5 = vmul.f32 %v2677_v37, %v1143_v55  ;;  %v1451_v10 = vmul.f32 %v2679_v57, %v1216_v59  ;;  %v1145_v11 = vpop.f32.mrb[13].mxu0  ;;  %v1218_v12 = vpop.f32.mrb[13].mxu1 }
 0x2ed   : > { %v1775_v13 = vmax.f32 %v1710_v45, %v1718_v63  ;;  %v1801_v17 = vmax.f32 %v1712_v46, %v1720_v4  ;;  %v1719_v18 = vsel %vm1687_vm5, %v1612_v51, -inf  ;;  %v1721_v20 = vsel %vm1687_vm5, %v1614_v54, -inf  ;;  %v1147_v21 = vpop.f32.mrb[14].mxu0  ;;  %v1220_v27 = vpop.f32.mrb[14].mxu1 }
 0x2ee   : > { %v1788_v28 = vmax.f32 %v1711_v49, %v1719_v18  ;;  %v1814_v29 = vmax.f32 %v1713_v50, %v1721_v20  ;;  %v1555_v30 = vadd.f32 %v2692_v52, %v1449_v5  ;;  %v1557_v31 = vadd.f32 %v2694_v53, %v1451_v10  ;;  %v1149_v16 = vpop.f32.mrb[15].mxu0  ;;  %v1222_v26 = vpop.f32.mrb[15].mxu1 }
 0x2ef   : > { %v1450_v23 = vmul.f32 %v2686_v40, %v1145_v11  ;;  %v1452_v22 = vmul.f32 %v2688_v41, %v1218_v12  ;;  %v1457_v32 = vmul.f32 %v2677_v37, %v1147_v21  ;;  %v1459_v19 = vmul.f32 %v2679_v57, %v1220_v27 }
 0x2f0   : > { %v1619_v33 = vmax.f32 %v1555_v30, 0.0  ;;  %v1621_v34 = vmax.f32 %v1557_v31, 0.0  ;;  %v1458_v35 = vmul.f32 %v2686_v40, %v1149_v16  ;;  %v1460_v36 = vmul.f32 %v2688_v41, %v1222_v26 }
 0x2f1   : > { %v1556_v38 = vadd.f32 %v2697_v56, %v1450_v23  ;;  %v1558_v43 = vadd.f32 %v2699_v58, %v1452_v22  ;;  %v1563_v44 = vadd.f32 %v2692_v52, %v1457_v32  ;;  %v1565_v45 = vadd.f32 %v2694_v53, %v1459_v19 }
 0x2f2   : > { %v1726_v46 = vsel %vm1688_vm6, %v1619_v33, -inf  ;;  %v1728_v47 = vsel %vm1688_vm6, %v1621_v34, -inf  ;;  %v1564_v48 = vadd.f32 %v2697_v56, %v1458_v35  ;;  %v1566_v49 = vadd.f32 %v2699_v58, %v1460_v36 }
 0x2f3   : > { %v1776_v50 = vmax.f32 %v1775_v13, %v1726_v46  ;;  %v1802_v51 = vmax.f32 %v1801_v17, %v1728_v47  ;;  %v1620_v54 = vmax.f32 %v1556_v38, 0.0  ;;  %v1622_v55 = vmax.f32 %v1558_v43, 0.0  ;;  %v1153_v59 = vpop.f32.mrb[16].mxu0  ;;  %v1226_v63 = vpop.f32.mrb[16].mxu1 }
 0x2f4   : > { %v1627_v4 = vmax.f32 %v1563_v44, 0.0  ;;  %v1629_v5 = vmax.f32 %v1565_v45, 0.0  ;;  %v1628_v10 = vmax.f32 %v1564_v48, 0.0  ;;  %v1630_v11 = vmax.f32 %v1566_v49, 0.0  ;;  %v1155_v12 = vpop.f32.mrb[17].mxu0  ;;  %v1228_v18 = vpop.f32.mrb[17].mxu1 }
 0x2f5   : > { %v1727_v20 = vsel %vm1688_vm6, %v1620_v54, -inf  ;;  %v1729_v21 = vsel %vm1688_vm6, %v1622_v55, -inf  ;;  %v1465_v27 = vmul.f32 %v2677_v37, %v1153_v59  ;;  %v1467_v13 = vmul.f32 %v2679_v57, %v1226_v63  ;;  %v1157_v17 = vpop.f32.mrb[18].mxu0  ;;  %v1230_v30 = vpop.f32.mrb[18].mxu1 }
 0x2f6   : > { %v1789_v31 = vmax.f32 %v1788_v28, %v1727_v20  ;;  %v1815_v16 = vmax.f32 %v1814_v29, %v1729_v21  ;;  %v1734_v26 = vsel %vm1689_vm7, %v1627_v4, -inf  ;;  %v1736_v23 = vsel %vm1689_vm7, %v1629_v5, -inf  ;;  %v1159_v22 = vpop.f32.mrb[19].mxu0  ;;  %v1232_v32 = vpop.f32.mrb[19].mxu1 }
 0x2f7   : > { %v1777_v19 = vmax.f32 %v1776_v50, %v1734_v26  ;;  %v1803_v33 = vmax.f32 %v1802_v51, %v1736_v23  ;;  %v1735_v34 = vsel %vm1689_vm7, %v1628_v10, -inf  ;;  %v1737_v35 = vsel %vm1689_vm7, %v1630_v11, -inf }
 0x2f8   : > { %v1790_v36 = vmax.f32 %v1789_v31, %v1735_v34  ;;  %v1816_v38 = vmax.f32 %v1815_v16, %v1737_v35  ;;  %v1571_v28 = vadd.f32 %v2692_v52, %v1465_v27  ;;  %v1573_v29 = vadd.f32 %v2694_v53, %v1467_v13 }
 0x2f9   : > { %v1466_v43 = vmul.f32 %v2686_v40, %v1155_v12  ;;  %v1468_v44 = vmul.f32 %v2688_v41, %v1228_v18  ;;  %v1473_v45 = vmul.f32 %v2677_v37, %v1157_v17  ;;  %v1475_v46 = vmul.f32 %v2679_v57, %v1230_v30 }
 0x2fa   : > { %v1635_v47 = vmax.f32 %v1571_v28, 0.0  ;;  %v1637_v48 = vmax.f32 %v1573_v29, 0.0  ;;  %v1474_v49 = vmul.f32 %v2686_v40, %v1159_v22  ;;  %v1476_v50 = vmul.f32 %v2688_v41, %v1232_v32 }
 0x2fb   : > { %v1572_v51 = vadd.f32 %v2697_v56, %v1466_v43  ;;  %v1574_v54 = vadd.f32 %v2699_v58, %v1468_v44  ;;  %v1579_v55 = vadd.f32 %v2692_v52, %v1473_v45  ;;  %v1581_v59 = vadd.f32 %v2694_v53, %v1475_v46  ;;  %v1163_v63 = vpop.f32.mrb[20].mxu0  ;;  %v1236_v4 = vpop.f32.mrb[20].mxu1 }
 0x2fc   : > { %v1742_v5 = vsel %vm1690_vm8, %v1635_v47, -inf  ;;  %v1744_v10 = vsel %vm1690_vm8, %v1637_v48, -inf  ;;  %v1580_v11 = vadd.f32 %v2697_v56, %v1474_v49  ;;  %v1582_v12 = vadd.f32 %v2699_v58, %v1476_v50  ;;  %v1165_v18 = vpop.f32.mrb[21].mxu0  ;;  %v1238_v20 = vpop.f32.mrb[21].mxu1 }
 0x2fd   : > { %v1778_v21 = vmax.f32 %v1777_v19, %v1742_v5  ;;  %v1804_v27 = vmax.f32 %v1803_v33, %v1744_v10  ;;  %v1636_v13 = vmax.f32 %v1572_v51, 0.0  ;;  %v1638_v17 = vmax.f32 %v1574_v54, 0.0  ;;  %v1167_v30 = vpop.f32.mrb[22].mxu0  ;;  %v1240_v31 = vpop.f32.mrb[22].mxu1 }
 0x2fe   : > { %v1643_v16 = vmax.f32 %v1579_v55, 0.0  ;;  %v1645_v26 = vmax.f32 %v1581_v59, 0.0  ;;  %v1644_v23 = vmax.f32 %v1580_v11, 0.0  ;;  %v1646_v22 = vmax.f32 %v1582_v12, 0.0  ;;  %v1169_v32 = vpop.f32.mrb[23].mxu0  ;;  %v1242_v34 = vpop.f32.mrb[23].mxu1 }
 0x2ff   : > { %v1743_v35 = vsel %vm1690_vm8, %v1636_v13, -inf  ;;  %v1745_v28 = vsel %vm1690_vm8, %v1638_v17, -inf  ;;  %v1481_v29 = vmul.f32 %v2677_v37, %v1163_v63  ;;  %v1483_v19 = vmul.f32 %v2679_v57, %v1236_v4 }
 0x300   : > { %v1791_v33 = vmax.f32 %v1790_v36, %v1743_v35  ;;  %v1817_v43 = vmax.f32 %v1816_v38, %v1745_v28  ;;  %v1750_v44 = vsel %vm1691_vm9, %v1643_v16, -inf  ;;  %v1752_v45 = vsel %vm1691_vm9, %v1645_v26, -inf }
 0x301   : > { %v1779_v46 = vmax.f32 %v1778_v21, %v1750_v44  ;;  %v1805_v47 = vmax.f32 %v1804_v27, %v1752_v45  ;;  %v1751_v48 = vsel %vm1691_vm9, %v1644_v23, -inf  ;;  %v1753_v49 = vsel %vm1691_vm9, %v1646_v22, -inf }
 0x302   : > { %v1792_v50 = vmax.f32 %v1791_v33, %v1751_v48  ;;  %v1818_v51 = vmax.f32 %v1817_v43, %v1753_v49  ;;  %v1587_v54 = vadd.f32 %v2692_v52, %v1481_v29  ;;  %v1589_v36 = vadd.f32 %v2694_v53, %v1483_v19 }
 0x303   : > { %v1482_v38 = vmul.f32 %v2686_v40, %v1165_v18  ;;  %v1484_v55 = vmul.f32 %v2688_v41, %v1238_v20  ;;  %v1489_v59 = vmul.f32 %v2677_v37, %v1167_v30  ;;  %v1491_v63 = vmul.f32 %v2679_v57, %v1240_v31  ;;  %v1279_v4 = vpop.f32.mrb[24].mxu0  ;;  %v1352_v5 = vpop.f32.mrb[24].mxu1 }
 0x304   : > { %v1651_v10 = vmax.f32 %v1587_v54, 0.0  ;;  %v1653_v11 = vmax.f32 %v1589_v36, 0.0  ;;  %v1490_v12 = vmul.f32 %v2686_v40, %v1169_v32  ;;  %v1492_v21 = vmul.f32 %v2688_v41, %v1242_v34  ;;  %v1281_v27 = vpop.f32.mrb[25].mxu0  ;;  %v1354_v13 = vpop.f32.mrb[25].mxu1 }
 0x305   : > { %v1588_v17 = vadd.f32 %v2697_v56, %v1482_v38  ;;  %v1590_v18 = vadd.f32 %v2699_v58, %v1484_v55  ;;  %v1595_v20 = vadd.f32 %v2692_v52, %v1489_v59  ;;  %v1597_v37 = vadd.f32 %v2694_v53, %v1491_v63  ;;  %v1283_v30 = vpop.f32.mrb[26].mxu0  ;;  %v1356_v57 = vpop.f32.mrb[26].mxu1 }
 0x306   : > { %v1758_v31 = vsel %vm1692_vm10, %v1651_v10, -inf  ;;  %v1760_v40 = vsel %vm1692_vm10, %v1653_v11, -inf  ;;  %v1596_v41 = vadd.f32 %v2697_v56, %v1490_v12  ;;  %v1598_v16 = vadd.f32 %v2699_v58, %v1492_v21  ;;  %v2854_v26 = vpop.f32.mrb[27].mxu0  ;;  %v2856_v23 = vpop.f32.mrb[27].mxu1 }
 0x307   : > { %v1780_v22 = vmax.f32 %v1779_v46, %v1758_v31  ;;  %v1806_v52 = vmax.f32 %v1805_v47, %v1760_v40  ;;  %v1652_v32 = vmax.f32 %v1588_v17, 0.0  ;;  %v1654_v53 = vmax.f32 %v1590_v18, 0.0 }
 0x308   : > { %v1659_v34 = vmax.f32 %v1595_v20, 0.0  ;;  %v1661_v35 = vmax.f32 %v1597_v37, 0.0  ;;  %v1660_v28 = vmax.f32 %v1596_v41, 0.0  ;;  %v1662_v29 = vmax.f32 %v1598_v16, 0.0 }
 0x309   : > { %v1759_v19 = vsel %vm1692_vm10, %v1652_v32, -inf  ;;  %v1761_v56 = vsel %vm1692_vm10, %v1654_v53, -inf  ;;  %v1437_v58 = vmul.f32 %v2714_v3, %v1279_v4  ;;  %v1439_v33 = vmul.f32 %v2718_v7, %v1352_v5 }
 0x30a   : > { %v1793_v43 = vmax.f32 %v1792_v50, %v1759_v19  ;;  %v1819_v44 = vmax.f32 %v1818_v51, %v1761_v56  ;;  %v1766_v45 = vsel %vm1693_vm11, %v1659_v34, -inf  ;;  %v1768_v46 = vsel %vm1693_vm11, %v1661_v35, -inf }
 0x30b   : > { %v1781_v47 = vmax.f32 %v1780_v22, %v1766_v45  ;;  %v1807_v48 = vmax.f32 %v1806_v52, %v1768_v46  ;;  %v1767_v49 = vsel %vm1693_vm11, %v1660_v28, -inf  ;;  %v1769_v54 = vsel %vm1693_vm11, %v1662_v29, -inf  ;;  %v2872_v36 = vpop.f32.mrb[28].mxu0  ;;  %v2874_v38 = vpop.f32.mrb[28].mxu1 }
 0x30c   : > { %v1794_v50 = vmax.f32 %v1793_v43, %v1767_v49  ;;  %v1820_v51 = vmax.f32 %v1819_v44, %v1769_v54  ;;  %v1543_v55 = vadd.f32 %v2716_v6, %v1437_v58  ;;  %v1545_v59 = vadd.f32 %v2720_v8, %v1439_v33  ;;  %v2878_v63 = vpop.f32.mrb[29].mxu0  ;;  %v2880_v4 = vpop.f32.mrb[29].mxu1 }
 0x30d   : > { %v1782_v5 = vrot.slane %v1781_v47, 4  ;;  %v1808_v10 = vrot.slane %v1807_v48, 4  ;;  %v1438_v11 = vmul.f32 %v2722_v9, %v1281_v27  ;;  %v1440_v12 = vmul.f32 %v2728_v15, %v1354_v13  ;;  %v2884_v21 = vpop.f32.mrb[30].mxu0  ;;  %v2886_v17 = vpop.f32.mrb[30].mxu1 }
 0x30e   : > { %v1795_v18 = vrot.slane %v1794_v50, 4  ;;  %v1821_v20 = vrot.slane %v1820_v51, 4  ;;  %v1607_v37 = vmax.f32 %v1543_v55, 0.0  ;;  %v1609_v31 = vmax.f32 %v1545_v59, 0.0  ;;  %v2888_v40 = vpop.f32.mrb[31].mxu0  ;;  %v2890_v41 = vpop.f32.mrb[31].mxu1 }
 0x30f   : > { %v1783_v16 = vmax.f32 %v1781_v47, %v1782_v5  ;;  %v1809_v22 = vmax.f32 %v1807_v48, %v1808_v10  ;;  %v1544_v52 = vadd.f32 %v2726_v14, %v1438_v11  ;;  %v1546_v27 = vadd.f32 %v2732_v24, %v1440_v12 }
 0x310   : > { %v1796_v32 = vmax.f32 %v1794_v50, %v1795_v18  ;;  %v1822_v13 = vmax.f32 %v1820_v51, %v1821_v20  ;;  %v2896_v53 = vsel %vm1686_vm4, %v1607_v37, -inf  ;;  %v2900_v34 = vsel %vm1686_vm4, %v1609_v31, -inf }
 0x311   : > { %v1784_v35 = vrot.slane %v1783_v16, 2  ;;  %v1810_v28 = vrot.slane %v1809_v22, 2  ;;  %v1608_v29 = vmax.f32 %v1544_v52, 0.0  ;;  %v1610_v19 = vmax.f32 %v1546_v27, 0.0 }
 0x312   : > { %v1797_v56 = vrot.slane %v1796_v32, 2  ;;  %v1823_v58 = vrot.slane %v1822_v13, 2  ;;  %v1445_v33 = vmul.f32 %v2714_v3, %v1283_v30  ;;  %v1447_v43 = vmul.f32 %v2718_v7, %v1356_v57 }
 0x313   : > { %v1785_v44 = vmax.f32 %v1783_v16, %v1784_v35  ;;  %v1811_v45 = vmax.f32 %v1809_v22, %v1810_v28  ;;  %v2906_v46 = vsel %vm1686_vm4, %v1608_v29, -inf  ;;  %v2910_v47 = vsel %vm1686_vm4, %v1610_v19, -inf  ;;  %v2912_v48 = vpop.f32.mrb[32].mxu0  ;;  %v2914_v49 = vpop.f32.mrb[32].mxu1 }
 0x314   : > { %v1798_v54 = vmax.f32 %v1796_v32, %v1797_v56  ;;  %v1824_v50 = vmax.f32 %v1822_v13, %v1823_v58  ;;  %v1551_v30 = vadd.f32 %v2716_v6, %v1445_v33  ;;  %v1553_v57 = vadd.f32 %v2720_v8, %v1447_v43  ;;  %v2918_v51 = vpop.f32.mrb[33].mxu0  ;;  %v2920_v55 = vpop.f32.mrb[33].mxu1 }
 0x315   : > { %v1786_v59 = vrot.slane %v1785_v44, 1  ;;  %v1812_v5 = vrot.slane %v1811_v45, 1  ;;  %v1446_v39 = vmul.f32 %v2722_v9, %v2854_v26  ;;  %v1448_v10 = vmul.f32 %v2728_v15, %v2856_v23  ;;  %v2926_v11 = vpop.f32.mrb[34].mxu0  ;;  %v2928_v12 = vpop.f32.mrb[34].mxu1 }
 0x316   : > { %v1799_v18 = vrot.slane %v1798_v54, 1  ;;  %v1825_v20 = vrot.slane %v1824_v50, 1  ;;  %v1615_v37 = vmax.f32 %v1551_v30, 0.0  ;;  %v1617_v31 = vmax.f32 %v1553_v57, 0.0  ;;  %v2930_v16 = vpop.f32.mrb[35].mxu0  ;;  %v2932_v22 = vpop.f32.mrb[35].mxu1 }
 0x317   : > { %v2934_v52 = vmax.f32 %v1785_v44, %v1786_v59  ;;  %v2936_v27 = vmax.f32 %v1811_v45, %v1812_v5  ;;  %v1552_v26 = vadd.f32 %v2726_v14, %v1446_v39  ;;  %v1554_v23 = vadd.f32 %v2732_v24, %v1448_v10 }
 0x318   : > { %v2940_v32 = vmax.f32 %v1798_v54, %v1799_v18  ;;  %v2942_v13 = vmax.f32 %v1824_v50, %v1825_v20  ;;  %v1722_v35 = vsel %vm1687_vm5, %v1615_v37, -inf  ;;  %v1724_v28 = vsel %vm1687_vm5, %v1617_v31, -inf }
 0x319   : > { %v1827_v29 = vmax.f32 %v2896_v53, %v1722_v35  ;;  %v1853_v19 = vmax.f32 %v2900_v34, %v1724_v28  ;;  %v1616_v56 = vmax.f32 %v1552_v26, 0.0  ;;  %v1618_v58 = vmax.f32 %v1554_v23, 0.0 }
 0x31a   : > { %v1887_v33 = vcombine.low %v2934_v52, %v2940_v32  ;;  %v1888_v43 = vcombine.low %v2936_v27, %v2942_v13  ;;  %v1453_v44 = vmul.f32 %v2714_v3, %v2872_v36  ;;  %v1455_v45 = vmul.f32 %v2718_v7, %v2874_v38 }
 0x31b   : > { %v1723_v54 = vsel %vm1687_vm5, %v1616_v56, -inf  ;;  %v1725_v53 = vsel %vm1687_vm5, %v1618_v58, -inf  ;;  %v1454_v34 = vmul.f32 %v2722_v9, %v2878_v63  ;;  %v1456_v50 = vmul.f32 %v2728_v15, %v2880_v4  ;;  %v2966_v30 = vpop.f32.mrb[36].mxu0  ;;  %v2968_v57 = vpop.f32.mrb[36].mxu1 }
 0x31c   : > { %v1840_v36 = vmax.f32 %v2906_v46, %v1723_v54  ;;  %v1866_v38 = vmax.f32 %v2910_v47, %v1725_v53  ;;  %v1559_v59 = vadd.f32 %v2716_v6, %v1453_v44  ;;  %v1561_v5 = vadd.f32 %v2720_v8, %v1455_v45  ;;  %v2974_v42 = vpop.f32.mrb[37].mxu0  ;;  %v2976_v39 = vpop.f32.mrb[37].mxu1 }
 0x31d   : > { %v1560_v63 = vadd.f32 %v2726_v14, %v1454_v34  ;;  %v1562_v4 = vadd.f32 %v2732_v24, %v1456_v50  ;;  %v1461_v10 = vmul.f32 %v2714_v3, %v2884_v21  ;;  %v1463_v46 = vmul.f32 %v2718_v7, %v2886_v17  ;;  %v2984_v18 = vpop.f32.mrb[38].mxu0  ;;  %v2986_v47 = vpop.f32.mrb[38].mxu1 }
 0x31e   : > { %v1623_v20 = vmax.f32 %v1559_v59, 0.0  ;;  %v1625_v37 = vmax.f32 %v1561_v5, 0.0  ;;  %v1462_v31 = vmul.f32 %v2722_v9, %v2888_v40  ;;  %v1464_v26 = vmul.f32 %v2728_v15, %v2890_v41  ;;  %v2992_v23 = vpop.f32.mrb[39].mxu0  ;;  %v2994_v35 = vpop.f32.mrb[39].mxu1 }
 0x31f   : > { %v1624_v21 = vmax.f32 %v1560_v63, 0.0  ;;  %v1626_v28 = vmax.f32 %v1562_v4, 0.0  ;;  %v1567_v17 = vadd.f32 %v2716_v6, %v1461_v10  ;;  %v1569_v56 = vadd.f32 %v2720_v8, %v1463_v46 }
 0x320   : > { %v1730_v58 = vsel %vm1688_vm6, %v1623_v20, -inf  ;;  %v1732_v44 = vsel %vm1688_vm6, %v1625_v37, -inf  ;;  %v1568_v40 = vadd.f32 %v2726_v14, %v1462_v31  ;;  %v1570_v41 = vadd.f32 %v2732_v24, %v1464_v26 }
 0x321   : > { %v1828_v45 = vmax.f32 %v1827_v29, %v1730_v58  ;;  %v1854_v54 = vmax.f32 %v1853_v19, %v1732_v44  ;;  %v1731_v53 = vsel %vm1688_vm6, %v1624_v21, -inf  ;;  %v1733_v34 = vsel %vm1688_vm6, %v1626_v28, -inf }
 0x322   : > { %v1841_v50 = vmax.f32 %v1840_v36, %v1731_v53  ;;  %v1867_v59 = vmax.f32 %v1866_v38, %v1733_v34  ;;  %v1631_v5 = vmax.f32 %v1567_v17, 0.0  ;;  %v1633_v63 = vmax.f32 %v1569_v56, 0.0 }
 0x323   : > { %v1632_v4 = vmax.f32 %v1568_v40, 0.0  ;;  %v1634_v10 = vmax.f32 %v1570_v41, 0.0  ;;  %v1469_v46 = vmul.f32 %v2714_v3, %v2912_v48  ;;  %v1471_v20 = vmul.f32 %v2718_v7, %v2914_v49 }
 0x324   : > { %v1738_v29 = vsel %vm1689_vm7, %v1631_v5, -inf  ;;  %v1740_v19 = vsel %vm1689_vm7, %v1633_v63, -inf  ;;  %v1470_v60 = vmul.f32 %v2722_v9, %v2918_v51  ;;  %v1472_v36 = vmul.f32 %v2728_v15, %v2920_v55 }
 0x325   : > { %v1829_v38 = vmax.f32 %v1828_v45, %v1738_v29  ;;  %v1855_v37 = vmax.f32 %v1854_v54, %v1740_v19  ;;  %v1739_v48 = vsel %vm1689_vm7, %v1632_v4, -inf  ;;  %v1741_v49 = vsel %vm1689_vm7, %v1634_v10, -inf }
 0x326   : > { %v1842_v31 = vmax.f32 %v1841_v50, %v1739_v48  ;;  %v1868_v26 = vmax.f32 %v1867_v59, %v1741_v49  ;;  %v1575_v21 = vadd.f32 %v2716_v6, %v1469_v46  ;;  %v1577_v28 = vadd.f32 %v2720_v8, %v1471_v20 }
 0x327   : > { %v1576_v17 = vadd.f32 %v2726_v14, %v1470_v60  ;;  %v1578_v51 = vadd.f32 %v2732_v24, %v1472_v36  ;;  %v1477_v55 = vmul.f32 %v2714_v3, %v2926_v11  ;;  %v1479_v56 = vmul.f32 %v2718_v7, %v2928_v12 }
 0x328   : > { %v1639_v58 = vmax.f32 %v1575_v21, 0.0  ;;  %v1641_v44 = vmax.f32 %v1577_v28, 0.0  ;;  %v1478_v61 = vmul.f32 %v2722_v9, %v2930_v16  ;;  %v1480_v40 = vmul.f32 %v2728_v15, %v2932_v22 }
 0x329   : > { %v1640_v41 = vmax.f32 %v1576_v17, 0.0  ;;  %v1642_v45 = vmax.f32 %v1578_v51, 0.0  ;;  %v1583_v54 = vadd.f32 %v2716_v6, %v1477_v55  ;;  %v1585_v53 = vadd.f32 %v2720_v8, %v1479_v56 }
 0x32a   : > { %v1746_v11 = vsel %vm1690_vm8, %v1639_v58, -inf  ;;  %v1748_v12 = vsel %vm1690_vm8, %v1641_v44, -inf  ;;  %v1584_v34 = vadd.f32 %v2726_v14, %v1478_v61  ;;  %v1586_v50 = vadd.f32 %v2732_v24, %v1480_v40 }
 0x32b   : > { %v1830_v16 = vmax.f32 %v1829_v38, %v1746_v11  ;;  %v1856_v59 = vmax.f32 %v1855_v37, %v1748_v12  ;;  %v1747_v22 = vsel %vm1690_vm8, %v1640_v41, -inf  ;;  %v1749_v5 = vsel %vm1690_vm8, %v1642_v45, -inf }
 0x32c   : > { %v1843_v63 = vmax.f32 %v1842_v31, %v1747_v22  ;;  %v1869_v4 = vmax.f32 %v1868_v26, %v1749_v5  ;;  %v1647_v10 = vmax.f32 %v1583_v54, 0.0  ;;  %v1649_v46 = vmax.f32 %v1585_v53, 0.0 }
 0x32d   : > { %v1648_v20 = vmax.f32 %v1584_v34, 0.0  ;;  %v1650_v29 = vmax.f32 %v1586_v50, 0.0  ;;  %v1485_v19 = vmul.f32 %v2714_v3, %v2966_v30  ;;  %v1487_v60 = vmul.f32 %v2718_v7, %v2968_v57 }
 0x32e   : > { %v1754_v36 = vsel %vm1691_vm9, %v1647_v10, -inf  ;;  %v1756_v38 = vsel %vm1691_vm9, %v1649_v46, -inf  ;;  %v1486_v62 = vmul.f32 %v2722_v9, %v2974_v42  ;;  %v1488_v37 = vmul.f32 %v2728_v15, %v2976_v39 }
 0x32f   : > { %v1831_v48 = vmax.f32 %v1830_v16, %v1754_v36  ;;  %v1857_v49 = vmax.f32 %v1856_v59, %v1756_v38  ;;  %v1755_v30 = vsel %vm1691_vm9, %v1648_v20, -inf  ;;  %v1757_v57 = vsel %vm1691_vm9, %v1650_v29, -inf }
 0x330   : > { %v1844_v31 = vmax.f32 %v1843_v63, %v1755_v30  ;;  %v1870_v26 = vmax.f32 %v1869_v4, %v1757_v57  ;;  %v1591_v21 = vadd.f32 %v2716_v6, %v1485_v19  ;;  %v1593_v28 = vadd.f32 %v2720_v8, %v1487_v60 }
 0x331   : > { %v1592_v17 = vadd.f32 %v2726_v14, %v1486_v62  ;;  %v1594_v42 = vadd.f32 %v2732_v24, %v1488_v37  ;;  %v1493_v39 = vmul.f32 %v2714_v3, %v2984_v18  ;;  %v1495_v51 = vmul.f32 %v2718_v7, %v2986_v47 }
 0x332   : > { %v1655_v55 = vmax.f32 %v1591_v21, 0.0  ;;  %v1657_v56 = vmax.f32 %v1593_v28, 0.0  ;;  %v1494_v0 = vmul.f32 %v2722_v9, %v2992_v23  ;;  %v1496_v58 = vmul.f32 %v2728_v15, %v2994_v35 }
 0x333   : > { %v1656_v44 = vmax.f32 %v1592_v17, 0.0  ;;  %v1658_v61 = vmax.f32 %v1594_v42, 0.0  ;;  %v1599_v40 = vadd.f32 %v2716_v6, %v1493_v39  ;;  %v1601_v41 = vadd.f32 %v2720_v8, %v1495_v51 }
 0x334   : > { %v1762_v3 = vsel %vm1692_vm10, %v1655_v55, -inf  ;;  %v1764_v7 = vsel %vm1692_vm10, %v1657_v56, -inf  ;;  %v1600_v18 = vadd.f32 %v2726_v14, %v1494_v0  ;;  %v1602_v47 = vadd.f32 %v2732_v24, %v1496_v58  ;;  %v1774_v56 = vld [vmem:[%s2587_s29] sm:$0xff] }
 0x335   : > { %v1832_v9 = vmax.f32 %v1831_v48, %v1762_v3  ;;  %v1858_v23 = vmax.f32 %v1857_v49, %v1764_v7  ;;  %v1763_v15 = vsel %vm1692_vm10, %v1656_v44, -inf  ;;  %v1765_v6 = vsel %vm1692_vm10, %v1658_v61, -inf }
 0x336   : > { %v1845_v35 = vmax.f32 %v1844_v31, %v1763_v15  ;;  %v1871_v8 = vmax.f32 %v1870_v26, %v1765_v6  ;;  %v1663_v45 = vmax.f32 %v1599_v40, 0.0  ;;  %v1665_v54 = vmax.f32 %v1601_v41, 0.0 }
 0x337   : > { %v1664_v53 = vmax.f32 %v1600_v18, 0.0  ;;  %v1666_v11 = vmax.f32 %v1602_v47, 0.0  ;;  %v1897_v14 = vrot.slane %v1887_v33, %v2734_v25  ;;  %v1904_v24 = vrot.slane %v1888_v43, %v2734_v25 }
 0x338   : > { %v1770_v1 = vsel %vm1693_vm11, %v1663_v45, -inf  ;;  %v1772_v12 = vsel %vm1693_vm11, %v1665_v54, -inf }
 0x339   : > { %v1833_v34 = vmax.f32 %v1832_v9, %v1770_v1  ;;  %v1859_v50 = vmax.f32 %v1858_v23, %v1772_v12  ;;  %v1771_v16 = vsel %vm1693_vm11, %v1664_v53, -inf  ;;  %v1773_v52 = vsel %vm1693_vm11, %v1666_v11, -inf }
 0x33a   : > { %v1846_v32 = vmax.f32 %v1845_v35, %v1771_v16  ;;  %v1872_v33 = vmax.f32 %v1871_v8, %v1773_v52  ;;  %v1919_v59 = vcombine.low %v1897_v14, %v1904_v24 }
 0x33b   : > { %v1834_v22 = vrot.slane %v1833_v34, 4  ;;  %v1860_v27 = vrot.slane %v1859_v50, 4 }
 0x33c   : > { %v1847_v13 = vrot.slane %v1846_v32, 4  ;;  %v1873_v43 = vrot.slane %v1872_v33, 4  ;;  %v1927_v51 = vrot.slane %v1919_v59, %v2734_v25 }
 0x33d   : > { %v1835_v5 = vmax.f32 %v1833_v34, %v1834_v22  ;;  %v1861_v63 = vmax.f32 %v1859_v50, %v1860_v27 }
 0x33e   : > { %v1848_v4 = vmax.f32 %v1846_v32, %v1847_v13  ;;  %v1874_v10 = vmax.f32 %v1872_v33, %v1873_v43 }
 0x33f   : > { %v1836_v46 = vrot.slane %v1835_v5, 2  ;;  %v1862_v20 = vrot.slane %v1861_v63, 2 }
 0x340   : > { %v1849_v29 = vrot.slane %v1848_v4, 2  ;;  %v1875_v19 = vrot.slane %v1874_v10, 2 }
 0x341   : > { %v1837_v60 = vmax.f32 %v1835_v5, %v1836_v46  ;;  %v1863_v36 = vmax.f32 %v1861_v63, %v1862_v20 }
 0x342   : > { %v1850_v38 = vmax.f32 %v1848_v4, %v1849_v29  ;;  %v1876_v2 = vmax.f32 %v1874_v10, %v1875_v19 }
 0x343   : > { %v1838_v62 = vrot.slane %v1837_v60, 1  ;;  %v1864_v37 = vrot.slane %v1863_v36, 1 }
 0x344   : > { %v1851_v48 = vrot.slane %v1850_v38, 1  ;;  %v1877_v49 = vrot.slane %v1876_v2, 1 }
 0x345   : > { %v1839_v30 = vmax.f32 %v1837_v60, %v1838_v62  ;;  %v1865_v57 = vmax.f32 %v1863_v36, %v1864_v37 }
 0x346   : > { %v1852_v31 = vmax.f32 %v1850_v38, %v1851_v48  ;;  %v1878_v26 = vmax.f32 %v1876_v2, %v1877_v49 }
 0x348   : > { %v1889_v21 = vcombine.low %v1839_v30, %v1852_v31  ;;  %v1890_v28 = vcombine.low %v1865_v57, %v1878_v26 }
 0x34a   : > { %v1911_v17 = vrot.slane %v1889_v21, %v2734_v25  ;;  %v1918_v42 = vrot.slane %v1890_v28, %v2734_v25 }
 0x34c   : > { %v1920_v39 = vcombine.low %v1911_v17, %v1918_v42 }
 0x34e   : > { %v1934_v55 = vrot.slane %v1920_v39, %v2734_v25 }
 0x350   : > { %v1935_v0 = vcombine.low %v1927_v51, %v1934_v55 }
 0x352   : > { %v1937_v58 = vmax.f32 %v1774_v56, %v1935_v0 }
 0x354   : > { %1938 = vst [vmem:[%s2587_s29] sm:$0xff] %v1937_v58 }
 0x355   : > { %2321 = shalt.err (!%p2318_p11)
}
 0x356   : > { %s2322_s29 = scalar_lea.hbm %s3114_s19, 128  ;;  %s2326_s16 = scalar_lea.hbm %s3180_s10, 256 }
 0x357   : > { %p2323_p12 = scmp.ne.s32.totalorder %s3114_s19, %s2322_s29  ;;  %p2327_p3 = scmp.lt.u32.totalorder %s3114_s19, %s3180_s10 }
 0x358   : > { %p2328_p9 = scmp.lt.u32.totalorder %s2326_s16, %s2322_s29  ;;  %p2330_p13 = scmp.lt.u32.totalorder %s2322_s29, %s3114_s19 }
 0x359   : > { %p2324_p1 = pnand %p2323_p12, %p3202_p0 }
 0x35a   : > { %p2329_p10 = por %p2328_p9, %p2327_p3 }
 0x35b   : > { %p2325_p4 = pneg %p2324_p1 }
 0x35c   : > { %p2331_p2 = por %p2330_p13, %p2329_p10 }
 0x35e   : > { %p2332_p5 = pnand %p2331_p2, %p2325_p4 }
 0x360   : > { %2335 = shalt.err (!%p2332_p5)
}
 0x361   : > { %2188 = dma.vmem_to_hbm [thread:$0]  (%p3202_p0), %s3116_s21, 128, %s3114_s19, %s1940_s28  }
 0x362 PF: > { %p2200_p6 = scmp.ge.s32.totalorder %s2406_s20, 2  ;;  %s1966_s22 = sand.u32 1, %s2378_s13  }
 0x363   : > { %p3203_p7 = scmp.ne.s32.totalorder %s3194_s27, 0  ;;  %s1967_s25 = scalar_lea.sflag [#allocation4], %s1966_s22 }
 0x365   : > { %p2195_p8 = pnand %p2200_p6, %p3203_p7 }
 0x367   : > { %2373 = dma.done.wait (!%p2195_p8), %s1967_s25, 128  }
 0x368   : > { %2375 = vsyncadd (!%p2195_p8), %s1967_s25, 4294967168  ;;  %s24_s20 = sadd.s32 1, %s2406_s20   ;;  %s3204_s26 = sld [smem:[#allocation12_spill]] }
 0x369   : > { %p21_p11 = scmp.ge.s32.totalorder %s24_s20, 10   ;;  %s3205_s16 = sld [smem:[#allocation8_spill]] }
 0x36a   : > { %s3206_s17 = sld [smem:[#allocation9_spill]]  ;;  %s3207_s18 = sld [smem:[#allocation10_spill]] }
 0x36b   : > { %s3208_s19 = sld [smem:[#allocation11_spill]]  ;;  %s3209_s13 = smov %s2382_s14 }
 0x36c   : > { %s3210_s14 = smov %s2386_s15  ;;  %23 = sbr.rel (!%p21_p11) target bundleno = 6 (0x6), region = 104 }
 0x36e   : > { %s3211_s15 = smov %s3204_s26 }
 0x373   :  { %1972 = vsyncpa [#allocation3], 1 }
 0x374   :  { %1974 = vsyncpa [#allocation3 + $0x1], 1 }
 0x375   :  { %1975 = vsyncpa [#allocation4], 1 }
 0x376   :  { %1977 = vsyncpa [#allocation4 + $0x1], 1 }

</bundles_post_ra>
